<compile_context>
chip_gen: v7x
topology: tpu7x:2x2x1
jax: 0.10.0
libtpu: 0.0.40
codegen_flags: <defaults>
</compile_context>

<pallas_src>
import math

import jax
import jax.numpy as jnp
from jax import lax
from jax.experimental import pallas as pl
from jax.experimental.pallas import tpu as pltpu

_LANE = 128
_SUBLANE = 8
_LOG_MEAN_CAP = math.log(1e6)   # MeanAct clamp applied pre-exp (inf-safety)


def _ru(v, m):
    return (v + m - 1) // m * m


def _pad2(a, rows, cols):
    r, c = a.shape
    return jnp.pad(a, ((0, rows - r), (0, cols - c)))


# ----------------------------------------------------------------------------
# Fused forward kernel (encoder -> z -> decoder -> ZINB heads + soft assign)
# ----------------------------------------------------------------------------
def _make_fused_kernel(n_enc, n_dec, n_clusters, alpha):
    """Ref order: xn, x, enc(W,b)*n_enc, Wmu,bmu, dec(W,b)*n_dec,
    Wmean,bmean, Wdisp,bdisp, Wpi,bpi, mu, then outputs z0,q,mean,disp,pi."""

    def kernel(*refs):
        it = iter(refs)
        xn_ref, x_ref = next(it), next(it)
        enc = [(next(it), next(it)) for _ in range(n_enc)]
        w_mu, b_mu = next(it), next(it)
        dec = [(next(it), next(it)) for _ in range(n_dec)]
        w_me, b_me = next(it), next(it)
        w_di, b_di = next(it), next(it)
        w_pi, b_pi = next(it), next(it)
        mu_ref = next(it)
        z0_ref, q_ref, mean_ref, disp_ref, pi_ref = (next(it) for _ in range(5))

        tm = x_ref.shape[0]

        def dense(h, w_r, b_r):
            w = w_r[...]
            y = jnp.dot(h.astype(w.dtype), w, preferred_element_type=jnp.float32)
            return y + b_r[...]            # bias add + activations stay f32

        # --- shared encoder pass over [noisy ; clean] -------------------------
        h = jnp.concatenate([xn_ref[...], x_ref[...]], axis=0)       # (2*tm, D)
        for w_r, b_r in enc:
            h = jnp.maximum(dense(h, w_r, b_r), 0.0)                 # ReLU
        z_both = dense(h, w_mu, b_mu)                                # (2*tm, Zp)
        z = z_both[:tm]        # noisy latent  -> decoder
        z0 = z_both[tm:]       # clean latent  -> output + soft assignment
        z0_ref[...] = z0.astype(z0_ref.dtype)

        # --- decoder + ZINB heads (three heads share the same LHS) ------------
        hd = z
        for w_r, b_r in dec:
            hd = jnp.maximum(dense(hd, w_r, b_r), 0.0)
        y_mean = dense(hd, w_me, b_me)
        mean_ref[...] = jnp.clip(jnp.exp(jnp.minimum(y_mean, _LOG_MEAN_CAP)),
                                 1e-5, 1e6).astype(mean_ref.dtype)    # MeanAct
        disp_ref[...] = jnp.clip(jax.nn.softplus(dense(hd, w_di, b_di)),
                                 1e-4, 1e4).astype(disp_ref.dtype)    # DispAct
        pi_ref[...] = jax.nn.sigmoid(dense(hd, w_pi, b_pi)).astype(pi_ref.dtype)

        # --- Student-t soft assignment on the clean latent --------------------
        mu = mu_ref[...]                                    # (Kp, Zp) f32
        zz = jnp.sum(z0 * z0, axis=1, keepdims=True)        # (tm, 1)
        mm = jnp.sum(mu * mu, axis=1, keepdims=True)        # (Kp, 1)
        cross = lax.dot_general(z0, mu, (((1,), (1,)), ((), ())),
                                preferred_element_type=jnp.float32)   # (tm, Kp)
        d2 = jnp.maximum(zz + mm.T - 2.0 * cross, 0.0)
        qu = pl.reciprocal(1.0 + d2 * (1.0 / alpha), approx=True)
        if alpha != 1.0:           # alpha == 1 -> exponent is 1, skip the pow
            qu = qu ** ((alpha + 1.0) / 2.0)
        col = lax.broadcasted_iota(jnp.int32, qu.shape, 1)
        qu = jnp.where(col < n_clusters, qu, 0.0)           # mask padded clusters
        q = qu / jnp.sum(qu, axis=1, keepdims=True)         # exact row-normalize
        q_ref[...] = q.astype(q_ref.dtype)

    return kernel


# ----------------------------------------------------------------------------
# Parameter init / padding & dtype prep
# ----------------------------------------------------------------------------
def init_params(key, input_dim, z_dim, encode_layers, decode_layers, n_clusters):
    def linear(k, fan_in, fan_out):
        kw, kb = jax.random.split(k)
        bound = 1.0 / math.sqrt(fan_in)
        w = jax.random.uniform(kw, (fan_in, fan_out), jnp.float32, -bound, bound)
        b = jax.random.uniform(kb, (1, fan_out), jnp.float32, -bound, bound)
        return w, b

    keys = jax.random.split(key, 16)
    ki = iter(keys)
    params = {}
    enc_dims = [input_dim] + encode_layers
    params["encoder"] = [linear(next(ki), enc_dims[i - 1], enc_dims[i])
                         for i in range(1, len(enc_dims))]
    params["enc_mu"] = linear(next(ki), encode_layers[-1], z_dim)
    dec_dims = [z_dim] + decode_layers
    params["decoder"] = [linear(next(ki), dec_dims[i - 1], dec_dims[i])
                         for i in range(1, len(dec_dims))]
    params["dec_mean"] = linear(next(ki), decode_layers[-1], input_dim)
    params["dec_disp"] = linear(next(ki), decode_layers[-1], input_dim)
    params["dec_pi"] = linear(next(ki), decode_layers[-1], input_dim)
    # cluster centers (self.mu, created in fit())
    params["mu"] = jax.random.normal(next(ki), (n_clusters, z_dim), jnp.float32)
    return params


def prepare_params(params, use_bf16=None):
    """Pad lane dims to 128-multiples with zeros and cast matmul weights."""
    if use_bf16 is None:
        try:
            kind = jax.devices()[0].device_kind.lower()
        except Exception:  # pragma: no cover
            kind = ""
        use_bf16 = "v5" not in kind        # bf16-in/f32-acc on v6e/v7x; f32 on v5
    mm_dtype = jnp.bfloat16 if use_bf16 else jnp.float32

    w_mu, b_mu = params["enc_mu"]
    w_me, b_me = params["dec_mean"]
    w_di, b_di = params["dec_disp"]
    w_pi, b_pi = params["dec_pi"]
    mu = params["mu"]

    z_dim = w_mu.shape[1]
    input_dim = w_me.shape[1]
    n_clusters = mu.shape[0]
    zp, dp, kp = _ru(z_dim, _LANE), _ru(input_dim, _LANE), _ru(n_clusters, _LANE)

    p = {}
    p["encoder"] = [(w.astype(mm_dtype), b.astype(jnp.float32))
                    for w, b in params["encoder"]]
    p["enc_mu"] = (_pad2(w_mu, w_mu.shape[0], zp).astype(mm_dtype),
                   _pad2(b_mu, 1, zp).astype(jnp.float32))
    dec_p = []
    for li, (w, b) in enumerate(params["decoder"]):
        if li == 0:                        # consumes the zp-padded latent
            w = _pad2(w, zp, w.shape[1])
        dec_p.append((w.astype(mm_dtype), b.astype(jnp.float32)))
    p["decoder"] = dec_p
    for name, (w, b) in (("dec_mean", (w_me, b_me)),
                         ("dec_disp", (w_di, b_di)),
                         ("dec_pi", (w_pi, b_pi))):
        p[name] = (_pad2(w, w.shape[0], dp).astype(mm_dtype),
                   _pad2(b, 1, dp).astype(jnp.float32))
    p["mu"] = _pad2(mu, kp, zp).astype(jnp.float32)    # soft-assign kept in f32
    p["dims"] = dict(z_dim=z_dim, input_dim=input_dim, n_clusters=n_clusters,
                     zp=zp, dp=dp, kp=kp)
    return p


# ----------------------------------------------------------------------------
# Forward (mirrors scDeepCluster.forward)
# ----------------------------------------------------------------------------
def scdeepcluster_forward(prepped, x, noise_key, sigma=1.0, alpha=1.0,
                          tile_m=128):
    dims = prepped["dims"]
    n, in_dim = x.shape
    x = x.astype(jnp.float32)

    # noisy branch input: x + randn_like(x) * sigma
    noise = jax.random.normal(noise_key, x.shape, jnp.float32)
    xn = x + sigma * noise

    # batch tiling (sublane-aligned), pad batch rows if needed
    tm = min(tile_m, _ru(n, _SUBLANE))
    n_pad = _ru(n, tm)
    if n_pad != n:
        pad = ((0, n_pad - n), (0, 0))
        x = jnp.pad(x, pad)
        xn = jnp.pad(xn, pad)

    n_enc = len(prepped["encoder"])
    n_dec = len(prepped["decoder"])
    zp, dp, kp = dims["zp"], dims["dp"], dims["kp"]

    inputs = [xn, x]
    for w, b in prepped["encoder"]:
        inputs += [w, b]
    inputs += list(prepped["enc_mu"])
    for w, b in prepped["decoder"]:
        inputs += [w, b]
    inputs += list(prepped["dec_mean"])
    inputs += list(prepped["dec_disp"])
    inputs += list(prepped["dec_pi"])
    inputs += [prepped["mu"]]

    def batch_spec(cols):
        return pl.BlockSpec((tm, cols), lambda i: (i, 0))

    def const_spec(shape):                 # weights stay resident in VMEM
        return pl.BlockSpec(shape, lambda i: (0, 0))

    in_specs = [batch_spec(in_dim), batch_spec(in_dim)]
    in_specs += [const_spec(a.shape) for a in inputs[2:]]

    out_shape = (
        jax.ShapeDtypeStruct((n_pad, zp), jnp.float32),   # z0 (lane padded)
        jax.ShapeDtypeStruct((n_pad, kp), jnp.float32),   # q  (lane padded)
        jax.ShapeDtypeStruct((n_pad, dp), jnp.float32),   # mean
        jax.ShapeDtypeStruct((n_pad, dp), jnp.float32),   # disp
        jax.ShapeDtypeStruct((n_pad, dp), jnp.float32),   # pi
    )
    out_specs = (batch_spec(zp), batch_spec(kp),
                 batch_spec(dp), batch_spec(dp), batch_spec(dp))

    kern = _make_fused_kernel(n_enc, n_dec, dims["n_clusters"], float(alpha))
    z0_p, q_p, mean_p, disp_p, pi_p = pl.pallas_call(
        kern,
        grid=(n_pad // tm,),
        in_specs=in_specs,
        out_specs=out_specs,
        out_shape=out_shape,
        compiler_params=pltpu.CompilerParams(
            dimension_semantics=("parallel",),
            vmem_limit_bytes=32 * 1024 * 1024),
    )(*inputs)

    z0 = z0_p[:n, :dims["z_dim"]]
    q = q_p[:n, :dims["n_clusters"]]
    _mean = mean_p[:n, :dims["input_dim"]]
    _disp = disp_p[:n, :dims["input_dim"]]
    _pi = pi_p[:n, :dims["input_dim"]]
    return z0, q, _mean, _disp, _pi


# ----------------------------------------------------------------------------
if __name__ == "__main__":
    batch = 8
    input_dim = 32
    z_dim = 8
    encode_layers = [64, 32]
    decode_layers = [32, 64]
    n_clusters = 4
    sigma = 1.0
    alpha = 1.0

    root = jax.random.PRNGKey(0)
    k_params, k_x, k_noise = jax.random.split(root, 3)

    params = init_params(k_params, input_dim, z_dim,
                         encode_layers, decode_layers, n_clusters)
    prepped = prepare_params(params)

    # non-negative "expression-like" input
    x = jax.random.uniform(k_x, (batch, input_dim), jnp.float32, 0.0, 2.0)

    fwd = jax.jit(lambda xx, kk: scdeepcluster_forward(
        prepped, xx, kk, sigma=sigma, alpha=alpha))

    z0, q, _mean, _disp, _pi = fwd(x, k_noise)
    jax.block_until_ready((z0, q, _mean, _disp, _pi))

    assert z0.shape == (batch, z_dim)
    assert q.shape == (batch, n_clusters)
    assert _mean.shape == (batch, input_dim)
    assert _disp.shape == (batch, input_dim)
    assert _pi.shape == (batch, input_dim)
    # q rows sum to 1; all outputs finite and heads in their clamp ranges
    assert bool(jnp.allclose(jnp.sum(q, axis=1), 1.0, atol=1e-5))
    assert bool(jnp.all(jnp.isfinite(z0)))
    assert bool(jnp.all((_mean >= 1e-5) & (_mean <= 1e6)))
    assert bool(jnp.all((_disp >= 1e-4) & (_disp <= 1e4)))
    assert bool(jnp.all((_pi >= 0.0) & (_pi <= 1.0)))

    print("KERNEL_OK")
</pallas_src>

<mosaic_0001>
module attributes {stable_mosaic.version = 11 : i64} {
  func.func @kernel(%arg0: i32, %arg1: memref<8x32xf32, #tpu.memory_space<vmem>>, %arg2: memref<8x32xf32, #tpu.memory_space<vmem>>, %arg3: memref<32x64xbf16, #tpu.memory_space<vmem>>, %arg4: memref<1x64xf32, #tpu.memory_space<vmem>>, %arg5: memref<64x32xbf16, #tpu.memory_space<vmem>>, %arg6: memref<1x32xf32, #tpu.memory_space<vmem>>, %arg7: memref<32x128xbf16, #tpu.memory_space<vmem>>, %arg8: memref<1x128xf32, #tpu.memory_space<vmem>>, %arg9: memref<128x32xbf16, #tpu.memory_space<vmem>>, %arg10: memref<1x32xf32, #tpu.memory_space<vmem>>, %arg11: memref<32x64xbf16, #tpu.memory_space<vmem>>, %arg12: memref<1x64xf32, #tpu.memory_space<vmem>>, %arg13: memref<64x128xbf16, #tpu.memory_space<vmem>>, %arg14: memref<1x128xf32, #tpu.memory_space<vmem>>, %arg15: memref<64x128xbf16, #tpu.memory_space<vmem>>, %arg16: memref<1x128xf32, #tpu.memory_space<vmem>>, %arg17: memref<64x128xbf16, #tpu.memory_space<vmem>>, %arg18: memref<1x128xf32, #tpu.memory_space<vmem>>, %arg19: memref<128x128xf32, #tpu.memory_space<vmem>>, %arg20: memref<8x128xf32, #tpu.memory_space<vmem>>, %arg21: memref<8x128xf32, #tpu.memory_space<vmem>>, %arg22: memref<8x128xf32, #tpu.memory_space<vmem>>, %arg23: memref<8x128xf32, #tpu.memory_space<vmem>>, %arg24: memref<8x128xf32, #tpu.memory_space<vmem>>) attributes {dimension_semantics = [#tpu.dimension_semantics<parallel>], iteration_bounds = array<i64: 1>, scalar_prefetch = 0 : i64, scratch_operands = 0 : i64, tpu.core_type = #tpu.core_type<tc>, window_params = [{transform_indices = @transform_0, window_bounds = array<i64: 8, 32>}, {transform_indices = @transform_1, window_bounds = array<i64: 8, 32>}, {pipeline_mode = #tpu.pipeline_mode<synchronous>, transform_indices = @transform_2, window_bounds = array<i64: 32, 64>}, {pipeline_mode = #tpu.pipeline_mode<synchronous>, transform_indices = @transform_3, window_bounds = array<i64: 1, 64>}, {pipeline_mode = #tpu.pipeline_mode<synchronous>, transform_indices = @transform_4, window_bounds = array<i64: 64, 32>}, {pipeline_mode = #tpu.pipeline_mode<synchronous>, transform_indices = @transform_5, window_bounds = array<i64: 1, 32>}, {pipeline_mode = #tpu.pipeline_mode<synchronous>, transform_indices = @transform_6, window_bounds = array<i64: 32, 128>}, {pipeline_mode = #tpu.pipeline_mode<synchronous>, transform_indices = @transform_7, window_bounds = array<i64: 1, 128>}, {pipeline_mode = #tpu.pipeline_mode<synchronous>, transform_indices = @transform_8, window_bounds = array<i64: 128, 32>}, {pipeline_mode = #tpu.pipeline_mode<synchronous>, transform_indices = @transform_9, window_bounds = array<i64: 1, 32>}, {pipeline_mode = #tpu.pipeline_mode<synchronous>, transform_indices = @transform_10, window_bounds = array<i64: 32, 64>}, {pipeline_mode = #tpu.pipeline_mode<synchronous>, transform_indices = @transform_11, window_bounds = array<i64: 1, 64>}, {pipeline_mode = #tpu.pipeline_mode<synchronous>, transform_indices = @transform_12, window_bounds = array<i64: 64, 128>}, {pipeline_mode = #tpu.pipeline_mode<synchronous>, transform_indices = @transform_13, window_bounds = array<i64: 1, 128>}, {pipeline_mode = #tpu.pipeline_mode<synchronous>, transform_indices = @transform_14, window_bounds = array<i64: 64, 128>}, {pipeline_mode = #tpu.pipeline_mode<synchronous>, transform_indices = @transform_15, window_bounds = array<i64: 1, 128>}, {pipeline_mode = #tpu.pipeline_mode<synchronous>, transform_indices = @transform_16, window_bounds = array<i64: 64, 128>}, {pipeline_mode = #tpu.pipeline_mode<synchronous>, transform_indices = @transform_17, window_bounds = array<i64: 1, 128>}, {pipeline_mode = #tpu.pipeline_mode<synchronous>, transform_indices = @transform_18, window_bounds = array<i64: 128, 128>}, {transform_indices = @transform_19, window_bounds = array<i64: 8, 128>}, {transform_indices = @transform_20, window_bounds = array<i64: 8, 128>}, {transform_indices = @transform_21, window_bounds = array<i64: 8, 128>}, {transform_indices = @transform_22, window_bounds = array<i64: 8, 128>}, {transform_indices = @transform_23, window_bounds = array<i64: 8, 128>}]} {
    %c0 = arith.constant 0 : index
    %c0_0 = arith.constant 0 : index
    %0 = vector.load %arg1[%c0, %c0_0] : memref<8x32xf32, #tpu.memory_space<vmem>>, vector<8x32xf32>
    %c0_1 = arith.constant 0 : index
    %c0_2 = arith.constant 0 : index
    %1 = vector.load %arg2[%c0_1, %c0_2] : memref<8x32xf32, #tpu.memory_space<vmem>>, vector<8x32xf32>
    %2 = tpu.concatenate %0, %1 in 0 : vector<8x32xf32>, vector<8x32xf32> -> vector<16x32xf32>
    %c0_3 = arith.constant 0 : index
    %c0_4 = arith.constant 0 : index
    %3 = vector.load %arg3[%c0_3, %c0_4] : memref<32x64xbf16, #tpu.memory_space<vmem>>, vector<32x64xbf16>
    %4 = arith.truncf %2 : vector<16x32xf32> to vector<16x32xbf16>
    %cst = arith.constant dense<0.000000e+00> : vector<16x64xf32>
    %5 = tpu.matmul %4, %3, %cst {dimension_numbers = #tpu.dot_dimension_numbers<[1], [0], [0], [1], [0, 0, 1, 1], [], []>} : vector<16x32xbf16>, vector<32x64xbf16>, vector<16x64xf32> -> vector<16x64xf32>
    %c0_5 = arith.constant 0 : index
    %c0_6 = arith.constant 0 : index
    %6 = vector.load %arg4[%c0_5, %c0_6] : memref<1x64xf32, #tpu.memory_space<vmem>>, vector<1x64xf32>
    %7 = vector.broadcast %6 : vector<1x64xf32> to vector<16x64xf32>
    %8 = arith.addf %5, %7 : vector<16x64xf32>
    %cst_7 = arith.constant 0.000000e+00 : f32
    %9 = vector.broadcast %cst_7 : f32 to vector<16x64xf32>
    %10 = arith.maximumf %8, %9 : vector<16x64xf32>
    %c0_8 = arith.constant 0 : index
    %c0_9 = arith.constant 0 : index
    %11 = vector.load %arg5[%c0_8, %c0_9] : memref<64x32xbf16, #tpu.memory_space<vmem>>, vector<64x32xbf16>
    %12 = arith.truncf %10 : vector<16x64xf32> to vector<16x64xbf16>
    %cst_10 = arith.constant dense<0.000000e+00> : vector<16x32xf32>
    %13 = tpu.matmul %12, %11, %cst_10 {dimension_numbers = #tpu.dot_dimension_numbers<[1], [0], [0], [1], [0, 0, 1, 1], [], []>} : vector<16x64xbf16>, vector<64x32xbf16>, vector<16x32xf32> -> vector<16x32xf32>
    %c0_11 = arith.constant 0 : index
    %c0_12 = arith.constant 0 : index
    %14 = vector.load %arg6[%c0_11, %c0_12] : memref<1x32xf32, #tpu.memory_space<vmem>>, vector<1x32xf32>
    %15 = vector.broadcast %14 : vector<1x32xf32> to vector<16x32xf32>
    %16 = arith.addf %13, %15 : vector<16x32xf32>
    %cst_13 = arith.constant 0.000000e+00 : f32
    %17 = vector.broadcast %cst_13 : f32 to vector<16x32xf32>
    %18 = arith.maximumf %16, %17 : vector<16x32xf32>
    %c0_14 = arith.constant 0 : index
    %c0_15 = arith.constant 0 : index
    %19 = vector.load %arg7[%c0_14, %c0_15] : memref<32x128xbf16, #tpu.memory_space<vmem>>, vector<32x128xbf16>
    %20 = arith.truncf %18 : vector<16x32xf32> to vector<16x32xbf16>
    %cst_16 = arith.constant dense<0.000000e+00> : vector<16x128xf32>
    %21 = tpu.matmul %20, %19, %cst_16 {dimension_numbers = #tpu.dot_dimension_numbers<[1], [0], [0], [1], [0, 0, 1, 1], [], []>} : vector<16x32xbf16>, vector<32x128xbf16>, vector<16x128xf32> -> vector<16x128xf32>
    %c0_17 = arith.constant 0 : index
    %c0_18 = arith.constant 0 : index
    %22 = vector.load %arg8[%c0_17, %c0_18] : memref<1x128xf32, #tpu.memory_space<vmem>>, vector<1x128xf32>
    %23 = vector.broadcast %22 : vector<1x128xf32> to vector<16x128xf32>
    %24 = arith.addf %21, %23 : vector<16x128xf32>
    %25 = vector.extract_strided_slice %24 {offsets = [0, 0], sizes = [8, 128], strides = [1, 1]} : vector<16x128xf32> to vector<8x128xf32>
    %26 = vector.extract_strided_slice %24 {offsets = [8, 0], sizes = [8, 128], strides = [1, 1]} : vector<16x128xf32> to vector<8x128xf32>
    %c0_19 = arith.constant 0 : index
    %c0_20 = arith.constant 0 : index
    %27 = vector.load %arg20[%c0_19, %c0_20] : memref<8x128xf32, #tpu.memory_space<vmem>>, vector<8x128xf32>
    tpu.vector_store %arg20[%c0_19, %c0_20], %26 {strides = array<i32>} : memref<8x128xf32, #tpu.memory_space<vmem>>, vector<8x128xf32>,
    %c0_21 = arith.constant 0 : index
    %c0_22 = arith.constant 0 : index
    %28 = vector.load %arg9[%c0_21, %c0_22] : memref<128x32xbf16, #tpu.memory_space<vmem>>, vector<128x32xbf16>
    %29 = arith.truncf %25 : vector<8x128xf32> to vector<8x128xbf16>
    %cst_23 = arith.constant dense<0.000000e+00> : vector<8x32xf32>
    %30 = tpu.matmul %29, %28, %cst_23 {dimension_numbers = #tpu.dot_dimension_numbers<[1], [0], [0], [1], [0, 0, 1, 1], [], []>} : vector<8x128xbf16>, vector<128x32xbf16>, vector<8x32xf32> -> vector<8x32xf32>
    %c0_24 = arith.constant 0 : index
    %c0_25 = arith.constant 0 : index
    %31 = vector.load %arg10[%c0_24, %c0_25] : memref<1x32xf32, #tpu.memory_space<vmem>>, vector<1x32xf32>
    %32 = vector.broadcast %31 : vector<1x32xf32> to vector<8x32xf32>
    %33 = arith.addf %30, %32 : vector<8x32xf32>
    %cst_26 = arith.constant 0.000000e+00 : f32
    %34 = vector.broadcast %cst_26 : f32 to vector<8x32xf32>
    %35 = arith.maximumf %33, %34 : vector<8x32xf32>
    %c0_27 = arith.constant 0 : index
    %c0_28 = arith.constant 0 : index
    %36 = vector.load %arg11[%c0_27, %c0_28] : memref<32x64xbf16, #tpu.memory_space<vmem>>, vector<32x64xbf16>
    %37 = arith.truncf %35 : vector<8x32xf32> to vector<8x32xbf16>
    %cst_29 = arith.constant dense<0.000000e+00> : vector<8x64xf32>
    %38 = tpu.matmul %37, %36, %cst_29 {dimension_numbers = #tpu.dot_dimension_numbers<[1], [0], [0], [1], [0, 0, 1, 1], [], []>} : vector<8x32xbf16>, vector<32x64xbf16>, vector<8x64xf32> -> vector<8x64xf32>
    %c0_30 = arith.constant 0 : index
    %c0_31 = arith.constant 0 : index
    %39 = vector.load %arg12[%c0_30, %c0_31] : memref<1x64xf32, #tpu.memory_space<vmem>>, vector<1x64xf32>
    %40 = vector.broadcast %39 : vector<1x64xf32> to vector<8x64xf32>
    %41 = arith.addf %38, %40 : vector<8x64xf32>
    %cst_32 = arith.constant 0.000000e+00 : f32
    %42 = vector.broadcast %cst_32 : f32 to vector<8x64xf32>
    %43 = arith.maximumf %41, %42 : vector<8x64xf32>
    %c0_33 = arith.constant 0 : index
    %c0_34 = arith.constant 0 : index
    %44 = vector.load %arg13[%c0_33, %c0_34] : memref<64x128xbf16, #tpu.memory_space<vmem>>, vector<64x128xbf16>
    %45 = arith.truncf %43 : vector<8x64xf32> to vector<8x64xbf16>
    %cst_35 = arith.constant dense<0.000000e+00> : vector<8x128xf32>
    %46 = tpu.matmul %45, %44, %cst_35 {dimension_numbers = #tpu.dot_dimension_numbers<[1], [0], [0], [1], [0, 0, 1, 1], [], []>} : vector<8x64xbf16>, vector<64x128xbf16>, vector<8x128xf32> -> vector<8x128xf32>
    %c0_36 = arith.constant 0 : index
    %c0_37 = arith.constant 0 : index
    %47 = vector.load %arg14[%c0_36, %c0_37] : memref<1x128xf32, #tpu.memory_space<vmem>>, vector<1x128xf32>
    %48 = vector.broadcast %47 : vector<1x128xf32> to vector<8x128xf32>
    %49 = arith.addf %46, %48 : vector<8x128xf32>
    %cst_38 = arith.constant 13.8155107 : f32
    %50 = vector.broadcast %cst_38 : f32 to vector<8x128xf32>
    %51 = arith.minimumf %49, %50 : vector<8x128xf32>
    %52 = math.exp %51 : vector<8x128xf32>
    %cst_39 = arith.constant 9.99999974E-6 : f32
    %cst_40 = arith.constant 1.000000e+06 : f32
    %53 = vector.broadcast %cst_39 : f32 to vector<8x128xf32>
    %54 = arith.maximumf %53, %52 : vector<8x128xf32>
    %55 = vector.broadcast %cst_40 : f32 to vector<8x128xf32>
    %56 = arith.minimumf %55, %54 : vector<8x128xf32>
    %c0_41 = arith.constant 0 : index
    %c0_42 = arith.constant 0 : index
    %57 = vector.load %arg22[%c0_41, %c0_42] : memref<8x128xf32, #tpu.memory_space<vmem>>, vector<8x128xf32>
    tpu.vector_store %arg22[%c0_41, %c0_42], %56 {strides = array<i32>} : memref<8x128xf32, #tpu.memory_space<vmem>>, vector<8x128xf32>,
    %c0_43 = arith.constant 0 : index
    %c0_44 = arith.constant 0 : index
    %58 = vector.load %arg15[%c0_43, %c0_44] : memref<64x128xbf16, #tpu.memory_space<vmem>>, vector<64x128xbf16>
    %59 = arith.truncf %43 : vector<8x64xf32> to vector<8x64xbf16>
    %cst_45 = arith.constant dense<0.000000e+00> : vector<8x128xf32>
    %60 = tpu.matmul %59, %58, %cst_45 {dimension_numbers = #tpu.dot_dimension_numbers<[1], [0], [0], [1], [0, 0, 1, 1], [], []>} : vector<8x64xbf16>, vector<64x128xbf16>, vector<8x128xf32> -> vector<8x128xf32>
    %c0_46 = arith.constant 0 : index
    %c0_47 = arith.constant 0 : index
    %61 = vector.load %arg16[%c0_46, %c0_47] : memref<1x128xf32, #tpu.memory_space<vmem>>, vector<1x128xf32>
    %62 = vector.broadcast %61 : vector<1x128xf32> to vector<8x128xf32>
    %63 = arith.addf %60, %62 : vector<8x128xf32>
    %cst_48 = arith.constant 0.000000e+00 : f32
    %64 = vector.broadcast %cst_48 : f32 to vector<8x128xf32>
    %65 = arith.maximumf %63, %64 : vector<8x128xf32>
    %66 = vector.broadcast %cst_48 : f32 to vector<8x128xf32>
    %67 = arith.subf %63, %66 : vector<8x128xf32>
    %68 = arith.cmpf one, %67, %67 : vector<8x128xf32>
    %69 = vector.broadcast %cst_48 : f32 to vector<8x128xf32>
    %70 = arith.addf %63, %69 : vector<8x128xf32>
    %71 = math.absf %67 : vector<8x128xf32>
    %cst_49 = arith.constant 0.000000e+00 : f32
    %72 = vector.broadcast %cst_49 : f32 to vector<8x128xf32>
    %73 = arith.subf %72, %71 : vector<8x128xf32>
    %74 = math.exp %73 : vector<8x128xf32>
    %75 = math.log1p %74 : vector<8x128xf32>
    %76 = arith.addf %65, %75 : vector<8x128xf32>
    %77 = arith.select %68, %70, %76 : vector<8x128xi1>, vector<8x128xf32>
    %cst_50 = arith.constant 9.99999974E-5 : f32
    %cst_51 = arith.constant 1.000000e+04 : f32
    %78 = vector.broadcast %cst_50 : f32 to vector<8x128xf32>
    %79 = arith.maximumf %78, %77 : vector<8x128xf32>
    %80 = vector.broadcast %cst_51 : f32 to vector<8x128xf32>
    %81 = arith.minimumf %80, %79 : vector<8x128xf32>
    %c0_52 = arith.constant 0 : index
    %c0_53 = arith.constant 0 : index
    %82 = vector.load %arg23[%c0_52, %c0_53] : memref<8x128xf32, #tpu.memory_space<vmem>>, vector<8x128xf32>
    tpu.vector_store %arg23[%c0_52, %c0_53], %81 {strides = array<i32>} : memref<8x128xf32, #tpu.memory_space<vmem>>, vector<8x128xf32>,
    %c0_54 = arith.constant 0 : index
    %c0_55 = arith.constant 0 : index
    %83 = vector.load %arg17[%c0_54, %c0_55] : memref<64x128xbf16, #tpu.memory_space<vmem>>, vector<64x128xbf16>
    %84 = arith.truncf %43 : vector<8x64xf32> to vector<8x64xbf16>
    %cst_56 = arith.constant dense<0.000000e+00> : vector<8x128xf32>
    %85 = tpu.matmul %84, %83, %cst_56 {dimension_numbers = #tpu.dot_dimension_numbers<[1], [0], [0], [1], [0, 0, 1, 1], [], []>} : vector<8x64xbf16>, vector<64x128xbf16>, vector<8x128xf32> -> vector<8x128xf32>
    %c0_57 = arith.constant 0 : index
    %c0_58 = arith.constant 0 : index
    %86 = vector.load %arg18[%c0_57, %c0_58] : memref<1x128xf32, #tpu.memory_space<vmem>>, vector<1x128xf32>
    %87 = vector.broadcast %86 : vector<1x128xf32> to vector<8x128xf32>
    %88 = arith.addf %85, %87 : vector<8x128xf32>
    %89 = arith.negf %88 : vector<8x128xf32>
    %90 = math.exp %89 : vector<8x128xf32>
    %cst_59 = arith.constant 1.000000e+00 : f32
    %91 = vector.broadcast %cst_59 : f32 to vector<8x128xf32>
    %92 = arith.addf %91, %90 : vector<8x128xf32>
    %93 = arith.divf %91, %92 : vector<8x128xf32>
    %c0_60 = arith.constant 0 : index
    %c0_61 = arith.constant 0 : index
    %94 = vector.load %arg24[%c0_60, %c0_61] : memref<8x128xf32, #tpu.memory_space<vmem>>, vector<8x128xf32>
    tpu.vector_store %arg24[%c0_60, %c0_61], %93 {strides = array<i32>} : memref<8x128xf32, #tpu.memory_space<vmem>>, vector<8x128xf32>,
    %c0_62 = arith.constant 0 : index
    %c0_63 = arith.constant 0 : index
    %95 = vector.load %arg19[%c0_62, %c0_63] : memref<128x128xf32, #tpu.memory_space<vmem>>, vector<128x128xf32>
    %96 = arith.mulf %26, %26 : vector<8x128xf32>
    %cst_64 = arith.constant dense<0.000000e+00> : vector<8xf32>
    %97 = vector.multi_reduction <add>, %96, %cst_64 [1] : vector<8x128xf32> to vector<8xf32>
    %98 = vector.shape_cast %97 : vector<8xf32> to vector<8x1xf32>
    %99 = arith.mulf %95, %95 : vector<128x128xf32>
    %cst_65 = arith.constant dense<0.000000e+00> : vector<128xf32>
    %100 = vector.multi_reduction <add>, %99, %cst_65 [1] : vector<128x128xf32> to vector<128xf32>
    %101 = vector.shape_cast %100 : vector<128xf32> to vector<128x1xf32>
    %cst_66 = arith.constant dense<0.000000e+00> : vector<8x128xf32>
    %102 = tpu.matmul %26, %95, %cst_66 {dimension_numbers = #tpu.dot_dimension_numbers<[1], [1], [0], [0], [0, 0, 1, 0], [], []>} : vector<8x128xf32>, vector<128x128xf32>, vector<8x128xf32> -> vector<8x128xf32>
    %103 = tpu.transpose %101, [1, 0] : vector<128x1xf32> -> vector<1x128xf32>
    %104 = vector.broadcast %98 : vector<8x1xf32> to vector<8x128xf32>
    %105 = vector.broadcast %103 : vector<1x128xf32> to vector<8x128xf32>
    %106 = arith.addf %104, %105 : vector<8x128xf32>
    %cst_67 = arith.constant 2.000000e+00 : f32
    %107 = vector.broadcast %cst_67 : f32 to vector<8x128xf32>
    %108 = arith.mulf %107, %102 : vector<8x128xf32>
    %109 = arith.subf %106, %108 : vector<8x128xf32>
    %cst_68 = arith.constant 0.000000e+00 : f32
    %110 = vector.broadcast %cst_68 : f32 to vector<8x128xf32>
    %111 = arith.maximumf %109, %110 : vector<8x128xf32>
    %cst_69 = arith.constant 1.000000e+00 : f32
    %112 = vector.broadcast %cst_69 : f32 to vector<8x128xf32>
    %113 = arith.mulf %111, %112 : vector<8x128xf32>
    %cst_70 = arith.constant 1.000000e+00 : f32
    %114 = vector.broadcast %cst_70 : f32 to vector<8x128xf32>
    %115 = arith.addf %114, %113 : vector<8x128xf32>
    %116 = tpu.reciprocal %115 {approx = true} : vector<8x128xf32> -> vector<8x128xf32>
    %117 = tpu.iota {dimensions = array<i32: 1>} : vector<8x128xi32>
    %c4_i32 = arith.constant 4 : i32
    %118 = vector.broadcast %c4_i32 : i32 to vector<8x128xi32>
    %119 = arith.cmpi slt, %117, %118 : vector<8x128xi32>
    %cst_71 = arith.constant 0.000000e+00 : f32
    %120 = vector.broadcast %cst_71 : f32 to vector<8x128xf32>
    %121 = arith.select %119, %116, %120 : vector<8x128xi1>, vector<8x128xf32>
    %cst_72 = arith.constant dense<0.000000e+00> : vector<8xf32>
    %122 = vector.multi_reduction <add>, %121, %cst_72 [1] : vector<8x128xf32> to vector<8xf32>
    %123 = vector.shape_cast %122 : vector<8xf32> to vector<8x1xf32>
    %124 = vector.broadcast %123 : vector<8x1xf32> to vector<8x128xf32>
    %125 = arith.divf %121, %124 : vector<8x128xf32>
    %c0_73 = arith.constant 0 : index
    %c0_74 = arith.constant 0 : index
    %126 = vector.load %arg21[%c0_73, %c0_74] : memref<8x128xf32, #tpu.memory_space<vmem>>, vector<8x128xf32>
    tpu.vector_store %arg21[%c0_73, %c0_74], %125 {strides = array<i32>} : memref<8x128xf32, #tpu.memory_space<vmem>>, vector<8x128xf32>,
    return
  }
  func.func @transform_0(%arg0: i32) -> (i32, i32) {
    %c0_i32 = arith.constant 0 : i32
    %c0_i32_0 = arith.constant 0 : i32
    return %arg0, %c0_i32 : i32, i32
  }
  func.func @transform_1(%arg0: i32) -> (i32, i32) {
    %c0_i32 = arith.constant 0 : i32
    %c0_i32_0 = arith.constant 0 : i32
    return %arg0, %c0_i32 : i32, i32
  }
  func.func @transform_2(%arg0: i32) -> (i32, i32) {
    %c0_i32 = arith.constant 0 : i32
    %c0_i32_0 = arith.constant 0 : i32
    %c0_i32_1 = arith.constant 0 : i32
    return %c0_i32, %c0_i32_0 : i32, i32
  }
  func.func @transform_3(%arg0: i32) -> (i32, i32) {
    %c0_i32 = arith.constant 0 : i32
    %c0_i32_0 = arith.constant 0 : i32
    %c0_i32_1 = arith.constant 0 : i32
    return %c0_i32, %c0_i32_0 : i32, i32
  }
  func.func @transform_4(%arg0: i32) -> (i32, i32) {
    %c0_i32 = arith.constant 0 : i32
    %c0_i32_0 = arith.constant 0 : i32
    %c0_i32_1 = arith.constant 0 : i32
    return %c0_i32, %c0_i32_0 : i32, i32
  }
  func.func @transform_5(%arg0: i32) -> (i32, i32) {
    %c0_i32 = arith.constant 0 : i32
    %c0_i32_0 = arith.constant 0 : i32
    %c0_i32_1 = arith.constant 0 : i32
    return %c0_i32, %c0_i32_0 : i32, i32
  }
  func.func @transform_6(%arg0: i32) -> (i32, i32) {
    %c0_i32 = arith.constant 0 : i32
    %c0_i32_0 = arith.constant 0 : i32
    %c0_i32_1 = arith.constant 0 : i32
    return %c0_i32, %c0_i32_0 : i32, i32
  }
  func.func @transform_7(%arg0: i32) -> (i32, i32) {
    %c0_i32 = arith.constant 0 : i32
    %c0_i32_0 = arith.constant 0 : i32
    %c0_i32_1 = arith.constant 0 : i32
    return %c0_i32, %c0_i32_0 : i32, i32
  }
  func.func @transform_8(%arg0: i32) -> (i32, i32) {
    %c0_i32 = arith.constant 0 : i32
    %c0_i32_0 = arith.constant 0 : i32
    %c0_i32_1 = arith.constant 0 : i32
    return %c0_i32, %c0_i32_0 : i32, i32
  }
  func.func @transform_9(%arg0: i32) -> (i32, i32) {
    %c0_i32 = arith.constant 0 : i32
    %c0_i32_0 = arith.constant 0 : i32
    %c0_i32_1 = arith.constant 0 : i32
    return %c0_i32, %c0_i32_0 : i32, i32
  }
  func.func @transform_10(%arg0: i32) -> (i32, i32) {
    %c0_i32 = arith.constant 0 : i32
    %c0_i32_0 = arith.constant 0 : i32
    %c0_i32_1 = arith.constant 0 : i32
    return %c0_i32, %c0_i32_0 : i32, i32
  }
  func.func @transform_11(%arg0: i32) -> (i32, i32) {
    %c0_i32 = arith.constant 0 : i32
    %c0_i32_0 = arith.constant 0 : i32
    %c0_i32_1 = arith.constant 0 : i32
    return %c0_i32, %c0_i32_0 : i32, i32
  }
  func.func @transform_12(%arg0: i32) -> (i32, i32) {
    %c0_i32 = arith.constant 0 : i32
    %c0_i32_0 = arith.constant 0 : i32
    %c0_i32_1 = arith.constant 0 : i32
    return %c0_i32, %c0_i32_0 : i32, i32
  }
  func.func @transform_13(%arg0: i32) -> (i32, i32) {
    %c0_i32 = arith.constant 0 : i32
    %c0_i32_0 = arith.constant 0 : i32
    %c0_i32_1 = arith.constant 0 : i32
    return %c0_i32, %c0_i32_0 : i32, i32
  }
  func.func @transform_14(%arg0: i32) -> (i32, i32) {
    %c0_i32 = arith.constant 0 : i32
    %c0_i32_0 = arith.constant 0 : i32
    %c0_i32_1 = arith.constant 0 : i32
    return %c0_i32, %c0_i32_0 : i32, i32
  }
  func.func @transform_15(%arg0: i32) -> (i32, i32) {
    %c0_i32 = arith.constant 0 : i32
    %c0_i32_0 = arith.constant 0 : i32
    %c0_i32_1 = arith.constant 0 : i32
    return %c0_i32, %c0_i32_0 : i32, i32
  }
  func.func @transform_16(%arg0: i32) -> (i32, i32) {
    %c0_i32 = arith.constant 0 : i32
    %c0_i32_0 = arith.constant 0 : i32
    %c0_i32_1 = arith.constant 0 : i32
    return %c0_i32, %c0_i32_0 : i32, i32
  }
  func.func @transform_17(%arg0: i32) -> (i32, i32) {
    %c0_i32 = arith.constant 0 : i32
    %c0_i32_0 = arith.constant 0 : i32
    %c0_i32_1 = arith.constant 0 : i32
    return %c0_i32, %c0_i32_0 : i32, i32
  }
  func.func @transform_18(%arg0: i32) -> (i32, i32) {
    %c0_i32 = arith.constant 0 : i32
    %c0_i32_0 = arith.constant 0 : i32
    %c0_i32_1 = arith.constant 0 : i32
    return %c0_i32, %c0_i32_0 : i32, i32
  }
  func.func @transform_19(%arg0: i32) -> (i32, i32) {
    %c0_i32 = arith.constant 0 : i32
    %c0_i32_0 = arith.constant 0 : i32
    return %arg0, %c0_i32 : i32, i32
  }
  func.func @transform_20(%arg0: i32) -> (i32, i32) {
    %c0_i32 = arith.constant 0 : i32
    %c0_i32_0 = arith.constant 0 : i32
    return %arg0, %c0_i32 : i32, i32
  }
  func.func @transform_21(%arg0: i32) -> (i32, i32) {
    %c0_i32 = arith.constant 0 : i32
    %c0_i32_0 = arith.constant 0 : i32
    return %arg0, %c0_i32 : i32, i32
  }
  func.func @transform_22(%arg0: i32) -> (i32, i32) {
    %c0_i32 = arith.constant 0 : i32
    %c0_i32_0 = arith.constant 0 : i32
    return %arg0, %c0_i32 : i32, i32
  }
  func.func @transform_23(%arg0: i32) -> (i32, i32) {
    %c0_i32 = arith.constant 0 : i32
    %c0_i32_0 = arith.constant 0 : i32
    return %arg0, %c0_i32 : i32, i32
  }
}

</mosaic_0001>

<bundles_post_ra>
// kernel: _lambda_.1
= control target key start
LH: loop header
LB: loop body
LE: loop exit
PB: predicated region body
PF: predicated region fallthrough
CT: control target
= control target key end

     0   :  { %s2545_s0 = inlined_call_operand.vmem [shape: f32[8,32], index: 0, kind: input, shape index: {}]   ;;  %s2546_s1 = inlined_call_operand.hbm [shape: f32[8,32], index: 1, kind: input, shape index: {}]   ;;  %s2547_s2 = inlined_call_operand.hbm [shape: bf16[32,64], index: 2, kind: input, shape index: {}]   ;;  %s2548_s3 = inlined_call_operand.hbm [shape: f32[1,64], index: 3, kind: input, shape index: {}]   ;;  %s2549_s4 = inlined_call_operand.hbm [shape: bf16[64,32], index: 4, kind: input, shape index: {}]   ;;  %s2550_s5 = inlined_call_operand.hbm [shape: f32[1,32], index: 5, kind: input, shape index: {}]   ;;  %s2551_s6 = inlined_call_operand.hbm [shape: bf16[32,128], index: 6, kind: input, shape index: {}]   ;;  %s2552_s7 = inlined_call_operand.hbm [shape: f32[1,128], index: 7, kind: input, shape index: {}]   ;;  %s2553_s8 = inlined_call_operand.hbm [shape: bf16[128,32], index: 8, kind: input, shape index: {}]   ;;  %s2554_s9 = inlined_call_operand.hbm [shape: f32[1,32], index: 9, kind: input, shape index: {}]   ;;  %s2555_s10 = inlined_call_operand.hbm [shape: bf16[32,64], index: 10, kind: input, shape index: {}]   ;;  %s2556_s11 = inlined_call_operand.hbm [shape: f32[1,64], index: 11, kind: input, shape index: {}]   ;;  %s2557_s12 = inlined_call_operand.hbm [shape: bf16[64,128], index: 12, kind: input, shape index: {}]   ;;  %s2558_s13 = inlined_call_operand.hbm [shape: f32[1,128], index: 13, kind: input, shape index: {}]   ;;  %s2559_s14 = inlined_call_operand.hbm [shape: bf16[64,128], index: 14, kind: input, shape index: {}]   ;;  %s2560_s15 = inlined_call_operand.vmem [shape: f32[1,128], index: 15, kind: input, shape index: {}]   ;;  %s2561_s16 = inlined_call_operand.vmem [shape: bf16[64,128], index: 16, kind: input, shape index: {}]   ;;  %s2562_s17 = inlined_call_operand.vmem [shape: f32[1,128], index: 17, kind: input, shape index: {}]   ;;  %s2563_s18 = inlined_call_operand.vmem [shape: f32[128,128], index: 18, kind: input, shape index: {}]   ;;  %s2564_s19 = inlined_call_operand.hbm [shape: f32[8,128], index: 19, kind: output, shape index: {0}]   ;;  %s2565_s20 = inlined_call_operand.vmem [shape: f32[8,128], index: 20, kind: output, shape index: {1}]   ;;  %s2566_s21 = inlined_call_operand.hbm [shape: f32[8,128], index: 21, kind: output, shape index: {2}]   ;;  %s2567_s22 = inlined_call_operand.hbm [shape: f32[8,128], index: 22, kind: output, shape index: {3}]   ;;  %s2568_s23 = inlined_call_operand.hbm [shape: f32[8,128], index: 23, kind: output, shape index: {4}]  }
   0x1   :  { %2578 = sst [smem:[#allocation42_spill]] %s2545_s0 }
   0x2   :  { %2579 = sst [smem:[#allocation43_spill]] %s2546_s1 }
   0x3   :  { %2580 = sst [smem:[#allocation44_spill]] %s2547_s2 }
   0x4   :  { %2581 = sst [smem:[#allocation45_spill]] %s2548_s3 }
   0x5   :  { %2582 = sst [smem:[#allocation46_spill]] %s2549_s4 }
   0x6   :  { %2583 = sst [smem:[#allocation47_spill]] %s2550_s5 }
   0x7   :  { %2584 = sst [smem:[#allocation48_spill]] %s2551_s6 }
   0x8   :  { %2585 = sst [smem:[#allocation49_spill]] %s2552_s7 }
   0x9   :  { %2586 = sst [smem:[#allocation50_spill]] %s2565_s20 }
   0xa   :  { %2587 = sst [smem:[#allocation51_spill]] %s2567_s22 }
   0xb   :  { %2588 = sst [smem:[#allocation52_spill]] %s2568_s23 }
   0xc   :  { %29 = vsyncpa [#allocation3], 0 }
   0xd   :  { %30 = vsyncpa [#allocation6], 0 }
   0xe   :  { %31 = vsyncpa [#allocation9], 0 }
   0xf   :  { %32 = vsyncpa [#allocation12], 0 }
  0x10   :  { %33 = vsyncpa [#allocation15], 0 }
  0x11   :  { %34 = vsyncpa [#allocation18], 0 }
  0x12   :  { %35 = vsyncpa [#allocation21], 0 }
  0x13   :  { %36 = vsyncpa [#allocation24], 0 }
  0x14   :  { %37 = vsyncpa [#allocation4], 0 }
  0x15   :  { %38 = vsyncpa [#allocation27], 0 }
  0x16   :  { %39 = vsyncpa [#allocation30], 0  ;;  %s1924_s4 = smov [#allocation5]   ;;  %s2589_s5 = sld [smem:[#allocation44_spill]] }
  0x17   :  { %s57_s30 = sshll.u32 %s1924_s4, 4  ;;  %s58_s30 = int_to_ptr.vmem [resolvable:$true] %s57_s30 }
  0x1c   :  { %s1506_s1 = scalar_lea.hbm %s2589_s5, 256 }
  0x1d   :  { %p1507_p0 = scmp.ne.s32.totalorder %s2589_s5, %s1506_s1  ;;  %p1510_p1 = scmp.lt.u32.totalorder %s1506_s1, %s2589_s5 }
  0x1f   :  { %p1512_p2 = pnand %p1510_p1, %p1507_p0 }
  0x21   :  { %1515 = shalt.err (!%p1512_p2)
}
  0x22   :  { %s1516_s7 = scalar_lea.vmem %s58_s30, 256  ;;  %p1521_p4 = scmp.lt.s32.totalorder %s58_s30, %s58_s30 }
  0x23   :  { %p1517_p3 = scmp.ne.s32.totalorder %s58_s30, %s1516_s7  ;;  %p1522_p5 = scmp.lt.s32.totalorder %s1516_s7, %s1516_s7 }
  0x25   :  { %p1523_p6 = por %p1522_p5, %p1521_p4 }
  0x27   :  { %p1524_p7 = pnand %p1523_p6, %p1517_p3 }
  0x29   :  { %1527 = shalt.err (!%p1524_p7)
}
  0x2a   :  { %s1925_s28 = smov 64   ;;  %s1926_s29 = smov 4  }
  0x2b   :  { %63 = dma.hbm_to_vmem [thread:$0]  %s2589_s5, 256, %s58_s30, [#allocation6], %s1925_s28, %s1925_s28, %s1926_s29  }
  0x2c   :  { %s1927_s4 = smov [#allocation8]   ;;  %s1928_s25 = smov [#allocation11]  }
  0x2d   :  { %s79_s24 = sshll.u32 %s1927_s4, 4  ;;  %s101_s1 = sshll.u32 %s1928_s25, 4  ;;  %s80_s24 = int_to_ptr.vmem [resolvable:$true] %s79_s24  ;;  %s102_s1 = int_to_ptr.vmem [resolvable:$true] %s101_s1 }
  0x2e   :  { %s2590_s6 = sld [smem:[#allocation46_spill]] }
  0x34   :  { %s1528_s27 = scalar_lea.hbm %s2590_s6, 512 }
  0x35   :  { %p1529_p8 = scmp.ne.s32.totalorder %s2590_s6, %s1528_s27  ;;  %p1532_p9 = scmp.lt.u32.totalorder %s1528_s27, %s2590_s6 }
  0x37   :  { %p1534_p10 = pnand %p1532_p9, %p1529_p8 }
  0x39   :  { %1537 = shalt.err (!%p1534_p10)
}
  0x3a   :  { %s1538_s30 = scalar_lea.vmem %s80_s24, 512  ;;  %p1543_p12 = scmp.lt.s32.totalorder %s80_s24, %s80_s24 }
  0x3b   :  { %p1539_p11 = scmp.ne.s32.totalorder %s80_s24, %s1538_s30  ;;  %p1544_p13 = scmp.lt.s32.totalorder %s1538_s30, %s1538_s30 }
  0x3d   :  { %p1545_p0 = por %p1544_p13, %p1543_p12 }
  0x3f   :  { %p1546_p1 = pnand %p1545_p0, %p1539_p11 }
  0x41   :  { %1549 = shalt.err (!%p1546_p1)
}
  0x42   :  { %85 = dma.hbm_to_vmem [thread:$0]  %s2590_s6, 512, %s80_s24, [#allocation9], %s1925_s28, %s1925_s28, %s1926_s29  }
  0x43   :  { %s2591_s23 = sld [smem:[#allocation48_spill]] }
  0x49   :  { %s1550_s0 = scalar_lea.hbm %s2591_s23, 256 }
  0x4a   :  { %p1551_p2 = scmp.ne.s32.totalorder %s2591_s23, %s1550_s0  ;;  %p1554_p3 = scmp.lt.u32.totalorder %s1550_s0, %s2591_s23 }
  0x4c   :  { %p1556_p4 = pnand %p1554_p3, %p1551_p2 }
  0x4e   :  { %1559 = shalt.err (!%p1556_p4)
}
  0x4f   :  { %s1560_s27 = scalar_lea.vmem %s102_s1, 256  ;;  %p1565_p6 = scmp.lt.s32.totalorder %s102_s1, %s102_s1 }
  0x50   :  { %p1561_p5 = scmp.ne.s32.totalorder %s102_s1, %s1560_s27  ;;  %p1566_p7 = scmp.lt.s32.totalorder %s1560_s27, %s1560_s27 }
  0x52   :  { %p1567_p8 = por %p1566_p7, %p1565_p6 }
  0x54   :  { %p1568_p9 = pnand %p1567_p8, %p1561_p5 }
  0x56   :  { %1571 = shalt.err (!%p1568_p9)
}
  0x57   :  { %107 = dma.hbm_to_vmem [thread:$0]  %s2591_s23, 256, %s102_s1, [#allocation12], %s1925_s28, %s1925_s28, %s1926_s29  }
  0x58   :  { %s1929_s7 = smov [#allocation14]   ;;  %s1930_s5 = smov [#allocation17]  }
  0x59   :  { %s123_s30 = sshll.u32 %s1929_s7, 4  ;;  %s145_s3 = sshll.u32 %s1930_s5, 4  ;;  %s124_s30 = int_to_ptr.vmem [resolvable:$true] %s123_s30  ;;  %s146_s3 = int_to_ptr.vmem [resolvable:$true] %s145_s3 }
  0x5a   :  { %s1572_s0 = scalar_lea.hbm %s2553_s8, 1024 }
  0x5b   :  { %p1573_p10 = scmp.ne.s32.totalorder %s2553_s8, %s1572_s0  ;;  %p1576_p11 = scmp.lt.u32.totalorder %s1572_s0, %s2553_s8 }
  0x5d   :  { %p1578_p12 = pnand %p1576_p11, %p1573_p10 }
  0x5f   :  { %1581 = shalt.err (!%p1578_p12)
}
  0x60   :  { %s1582_s1 = scalar_lea.vmem %s124_s30, 1024  ;;  %p1587_p0 = scmp.lt.s32.totalorder %s124_s30, %s124_s30 }
  0x61   :  { %p1583_p13 = scmp.ne.s32.totalorder %s124_s30, %s1582_s1  ;;  %p1588_p1 = scmp.lt.s32.totalorder %s1582_s1, %s1582_s1 }
  0x63   :  { %p1589_p2 = por %p1588_p1, %p1587_p0 }
  0x65   :  { %p1590_p3 = pnand %p1589_p2, %p1583_p13 }
  0x67   :  { %1593 = shalt.err (!%p1590_p3)
}
  0x68   :  { %129 = dma.hbm_to_vmem [thread:$0]  %s2553_s8, 1024, %s124_s30, [#allocation15], %s1925_s28, %s1925_s28, %s1926_s29  }
  0x69   :  { %s1594_s7 = scalar_lea.hbm %s2555_s10, 256 }
  0x6a   :  { %p1595_p4 = scmp.ne.s32.totalorder %s2555_s10, %s1594_s7  ;;  %p1598_p5 = scmp.lt.u32.totalorder %s1594_s7, %s2555_s10 }
  0x6c   :  { %p1600_p6 = pnand %p1598_p5, %p1595_p4 }
  0x6e   :  { %1603 = shalt.err (!%p1600_p6)
}
  0x6f   :  { %s1604_s4 = scalar_lea.vmem %s146_s3, 256  ;;  %p1609_p8 = scmp.lt.s32.totalorder %s146_s3, %s146_s3 }
  0x70   :  { %p1605_p7 = scmp.ne.s32.totalorder %s146_s3, %s1604_s4  ;;  %p1610_p9 = scmp.lt.s32.totalorder %s1604_s4, %s1604_s4 }
  0x72   :  { %p1611_p10 = por %p1610_p9, %p1609_p8 }
  0x74   :  { %p1612_p11 = pnand %p1611_p10, %p1605_p7 }
  0x76   :  { %1615 = shalt.err (!%p1612_p11)
}
  0x77   :  { %151 = dma.hbm_to_vmem [thread:$0]  %s2555_s10, 256, %s146_s3, [#allocation18], %s1925_s28, %s1925_s28, %s1926_s29  }
  0x78   :  { %s1931_s25 = smov [#allocation20]   ;;  %s1932_s2 = smov [#allocation2]  }
  0x79   :  { %s167_s26 = sshll.u32 %s1931_s25, 4  ;;  %s48_s1 = sshll.u32 %s1932_s2, 4  ;;  %s168_s26 = int_to_ptr.vmem [resolvable:$true] %s167_s26  ;;  %s49_s1 = int_to_ptr.vmem [resolvable:$true] %s48_s1 }
  0x7a   :  { %s1616_s24 = scalar_lea.hbm %s2557_s12, 512 }
  0x7b   :  { %p1617_p12 = scmp.ne.s32.totalorder %s2557_s12, %s1616_s24  ;;  %p1620_p13 = scmp.lt.u32.totalorder %s1616_s24, %s2557_s12 }
  0x7d   :  { %p1622_p0 = pnand %p1620_p13, %p1617_p12 }
  0x7f   :  { %1625 = shalt.err (!%p1622_p0)
}
  0x80   :  { %s1626_s10 = scalar_lea.vmem %s168_s26, 512  ;;  %p1631_p2 = scmp.lt.s32.totalorder %s168_s26, %s168_s26 }
  0x81   :  { %p1627_p1 = scmp.ne.s32.totalorder %s168_s26, %s1626_s10  ;;  %p1632_p3 = scmp.lt.s32.totalorder %s1626_s10, %s1626_s10 }
  0x83   :  { %p1633_p4 = por %p1632_p3, %p1631_p2 }
  0x85   :  { %p1634_p5 = pnand %p1633_p4, %p1627_p1 }
  0x87   :  { %1637 = shalt.err (!%p1634_p5)
}
  0x88   :  { %173 = dma.hbm_to_vmem [thread:$0]  %s2557_s12, 512, %s168_s26, [#allocation21], %s1925_s28, %s1925_s28, %s1926_s29  }
  0x89   :  { %s2592_s8 = sld [smem:[#allocation43_spill]] }
  0x8f   :  { %s1638_s30 = scalar_lea.hbm %s2592_s8, 128 }
  0x90   :  { %p1639_p6 = scmp.ne.s32.totalorder %s2592_s8, %s1638_s30  ;;  %p1642_p7 = scmp.lt.u32.totalorder %s1638_s30, %s2592_s8 }
  0x92   :  { %p1644_p8 = pnand %p1642_p7, %p1639_p6 }
  0x94   :  { %1647 = shalt.err (!%p1644_p8)
}
  0x95   :  { %s1648_s24 = scalar_lea.vmem %s49_s1, 128  ;;  %p1653_p10 = scmp.lt.s32.totalorder %s49_s1, %s49_s1 }
  0x96   :  { %p1649_p9 = scmp.ne.s32.totalorder %s49_s1, %s1648_s24  ;;  %p1654_p11 = scmp.lt.s32.totalorder %s1648_s24, %s1648_s24 }
  0x98   :  { %p1655_p12 = por %p1654_p11, %p1653_p10 }
  0x9a   :  { %p1656_p13 = pnand %p1655_p12, %p1649_p9 }
  0x9c   :  { %1659 = shalt.err (!%p1656_p13)
}
  0x9d   :  { %51 = dma.hbm_to_vmem [thread:$0]  %s2592_s8, 128, %s49_s1, [#allocation3]  }
  0x9e   :  { %s1933_s6 = smov [#allocation7]   ;;  %s1934_s5 = smov [#allocation10]  }
  0x9f   :  { %s70_s7 = sshll.u32 %s1933_s6, 4  ;;  %s92_s20 = sshll.u32 %s1934_s5, 4  ;;  %s71_s7 = int_to_ptr.vmem [resolvable:$true] %s70_s7  ;;  %s93_s20 = int_to_ptr.vmem [resolvable:$true] %s92_s20 }
  0xa0   :  { %s2593_s22 = sld [smem:[#allocation45_spill]] }
  0xa6   :  { %s1660_s0 = scalar_lea.hbm %s2593_s22, 16 }
  0xa7   :  { %p1661_p0 = scmp.ne.s32.totalorder %s2593_s22, %s1660_s0  ;;  %p1664_p1 = scmp.lt.u32.totalorder %s1660_s0, %s2593_s22 }
  0xa9   :  { %p1666_p2 = pnand %p1664_p1, %p1661_p0 }
  0xab   :  { %1669 = shalt.err (!%p1666_p2)
}
  0xac   :  { %s1670_s1 = scalar_lea.vmem %s71_s7, 16  ;;  %s1674_s8 = scalar_lea.vmem %s71_s7, 32 }
  0xad   :  { %p1671_p3 = scmp.ne.s32.totalorder %s71_s7, %s1670_s1  ;;  %p1675_p4 = scmp.lt.s32.totalorder %s71_s7, %s71_s7 }
  0xae   :  { %p1676_p5 = scmp.lt.s32.totalorder %s1674_s8, %s1670_s1 }
  0xb0   :  { %p1677_p6 = por %p1676_p5, %p1675_p4 }
  0xb2   :  { %p1678_p7 = pnand %p1677_p6, %p1671_p3 }
  0xb4   :  { %1681 = shalt.err (!%p1678_p7)
}
  0xb5   :  { %73 = dma.hbm_to_vmem [thread:$0]  %s2593_s22, 16, %s71_s7, [#allocation6]  }
  0xb6   :  { %s2594_s26 = sld [smem:[#allocation47_spill]] }
  0xbc   :  { %s1682_s6 = scalar_lea.hbm %s2594_s26, 16 }
  0xbd   :  { %p1683_p8 = scmp.ne.s32.totalorder %s2594_s26, %s1682_s6  ;;  %p1686_p9 = scmp.lt.u32.totalorder %s1682_s6, %s2594_s26 }
  0xbf   :  { %p1688_p10 = pnand %p1686_p9, %p1683_p8 }
  0xc1   :  { %1691 = shalt.err (!%p1688_p10)
}
  0xc2   :  { %s1692_s4 = scalar_lea.vmem %s93_s20, 16  ;;  %s1696_s30 = scalar_lea.vmem %s93_s20, 32 }
  0xc3   :  { %p1693_p11 = scmp.ne.s32.totalorder %s93_s20, %s1692_s4  ;;  %p1697_p12 = scmp.lt.s32.totalorder %s93_s20, %s93_s20 }
  0xc4   :  { %p1698_p13 = scmp.lt.s32.totalorder %s1696_s30, %s1692_s4 }
  0xc6   :  { %p1699_p0 = por %p1698_p13, %p1697_p12 }
  0xc8   :  { %p1700_p1 = pnand %p1699_p0, %p1693_p11 }
  0xca   :  { %1703 = shalt.err (!%p1700_p1)
}
  0xcb   :  { %95 = dma.hbm_to_vmem [thread:$0]  %s2594_s26, 16, %s93_s20, [#allocation9]  }
  0xcc   :  { %s1935_s25 = smov [#allocation13]   ;;  %s1936_s1 = smov [#allocation16]  }
  0xcd   :  { %s114_s2 = sshll.u32 %s1935_s25, 4  ;;  %s136_s8 = sshll.u32 %s1936_s1, 4  ;;  %s115_s2 = int_to_ptr.vmem [resolvable:$true] %s114_s2  ;;  %s137_s8 = int_to_ptr.vmem [resolvable:$true] %s136_s8 }
  0xce   :  { %s2595_s24 = sld [smem:[#allocation49_spill]] }
  0xd4   :  { %s1704_s12 = scalar_lea.hbm %s2595_s24, 16 }
  0xd5   :  { %p1705_p2 = scmp.ne.s32.totalorder %s2595_s24, %s1704_s12  ;;  %p1708_p3 = scmp.lt.u32.totalorder %s1704_s12, %s2595_s24 }
  0xd7   :  { %p1710_p4 = pnand %p1708_p3, %p1705_p2 }
  0xd9   :  { %1713 = shalt.err (!%p1710_p4)
}
  0xda   :  { %s1714_s20 = scalar_lea.vmem %s115_s2, 16  ;;  %s1718_s26 = scalar_lea.vmem %s115_s2, 32 }
  0xdb   :  { %p1715_p5 = scmp.ne.s32.totalorder %s115_s2, %s1714_s20  ;;  %p1719_p6 = scmp.lt.s32.totalorder %s115_s2, %s115_s2 }
  0xdc   :  { %p1720_p7 = scmp.lt.s32.totalorder %s1718_s26, %s1714_s20 }
  0xde   :  { %p1721_p8 = por %p1720_p7, %p1719_p6 }
  0xe0   :  { %p1722_p9 = pnand %p1721_p8, %p1715_p5 }
  0xe2   :  { %1725 = shalt.err (!%p1722_p9)
}
  0xe3   :  { %117 = dma.hbm_to_vmem [thread:$0]  %s2595_s24, 16, %s115_s2, [#allocation12]  }
  0xe4   :  { %s1726_s22 = scalar_lea.hbm %s2554_s9, 16 }
  0xe5   :  { %p1727_p10 = scmp.ne.s32.totalorder %s2554_s9, %s1726_s22  ;;  %p1730_p11 = scmp.lt.u32.totalorder %s1726_s22, %s2554_s9 }
  0xe7   :  { %p1732_p12 = pnand %p1730_p11, %p1727_p10 }
  0xe9   :  { %1735 = shalt.err (!%p1732_p12)
}
  0xea   :  { %s1736_s12 = scalar_lea.vmem %s137_s8, 16  ;;  %s1740_s6 = scalar_lea.vmem %s137_s8, 32 }
  0xeb   :  { %p1737_p13 = scmp.ne.s32.totalorder %s137_s8, %s1736_s12  ;;  %p1741_p0 = scmp.lt.s32.totalorder %s137_s8, %s137_s8 }
  0xec   :  { %p1742_p1 = scmp.lt.s32.totalorder %s1740_s6, %s1736_s12 }
  0xee   :  { %p1743_p2 = por %p1742_p1, %p1741_p0 }
  0xf0   :  { %p1744_p3 = pnand %p1743_p2, %p1737_p13 }
  0xf2   :  { %1747 = shalt.err (!%p1744_p3)
}
  0xf3   :  { %139 = dma.hbm_to_vmem [thread:$0]  %s2554_s9, 16, %s137_s8, [#allocation15]  }
  0xf4   :  { %s1937_s5 = smov [#allocation19]   ;;  %s1938_s3 = smov [#allocation22]  }
  0xf5   :  { %s158_s10 = sshll.u32 %s1937_s5, 4  ;;  %s180_s20 = sshll.u32 %s1938_s3, 4  ;;  %s159_s10 = int_to_ptr.vmem [resolvable:$true] %s158_s10  ;;  %s181_s20 = int_to_ptr.vmem [resolvable:$true] %s180_s20 }
  0xf6   :  { %s1748_s4 = scalar_lea.hbm %s2556_s11, 16 }
  0xf7   :  { %p1749_p4 = scmp.ne.s32.totalorder %s2556_s11, %s1748_s4  ;;  %p1752_p5 = scmp.lt.u32.totalorder %s1748_s4, %s2556_s11 }
  0xf9   :  { %p1754_p6 = pnand %p1752_p5, %p1749_p4 }
  0xfb   :  { %1757 = shalt.err (!%p1754_p6)
}
  0xfc   :  { %s1758_s9 = scalar_lea.vmem %s159_s10, 16  ;;  %s1762_s8 = scalar_lea.vmem %s159_s10, 32 }
  0xfd   :  { %p1759_p7 = scmp.ne.s32.totalorder %s159_s10, %s1758_s9  ;;  %p1763_p8 = scmp.lt.s32.totalorder %s159_s10, %s159_s10 }
  0xfe   :  { %p1764_p9 = scmp.lt.s32.totalorder %s1762_s8, %s1758_s9 }
 0x100   :  { %p1765_p10 = por %p1764_p9, %p1763_p8 }
 0x102   :  { %p1766_p11 = pnand %p1765_p10, %p1759_p7 }
 0x104   :  { %1769 = shalt.err (!%p1766_p11)
}
 0x105   :  { %161 = dma.hbm_to_vmem [thread:$0]  %s2556_s11, 16, %s159_s10, [#allocation18]  }
 0x106   :  { %s1770_s6 = scalar_lea.hbm %s2558_s13, 16 }
 0x107   :  { %p1771_p12 = scmp.ne.s32.totalorder %s2558_s13, %s1770_s6  ;;  %p1774_p13 = scmp.lt.u32.totalorder %s1770_s6, %s2558_s13 }
 0x109   :  { %p1776_p0 = pnand %p1774_p13, %p1771_p12 }
 0x10b   :  { %1779 = shalt.err (!%p1776_p0)
}
 0x10c   :  { %s1780_s26 = scalar_lea.vmem %s181_s20, 16  ;;  %s1784_s0 = scalar_lea.vmem %s181_s20, 32 }
 0x10d   :  { %p1781_p1 = scmp.ne.s32.totalorder %s181_s20, %s1780_s26  ;;  %p1785_p2 = scmp.lt.s32.totalorder %s181_s20, %s181_s20 }
 0x10e   :  { %p1786_p3 = scmp.lt.s32.totalorder %s1784_s0, %s1780_s26 }
 0x110   :  { %p1787_p4 = por %p1786_p3, %p1785_p2 }
 0x112   :  { %p1788_p5 = pnand %p1787_p4, %p1781_p1 }
 0x114   :  { %1791 = shalt.err (!%p1788_p5)
}
 0x115   :  { %183 = dma.hbm_to_vmem [thread:$0]  %s2558_s13, 16, %s181_s20, [#allocation21]  }
 0x116   :  { %s1939_s4 = smov [#allocation23]   ;;  %s1792_s25 = scalar_lea.hbm %s2559_s14, 512 }
 0x117   :  { %s189_s30 = sshll.u32 %s1939_s4, 4  ;;  %p1793_p6 = scmp.ne.s32.totalorder %s2559_s14, %s1792_s25  ;;  %s190_s30 = int_to_ptr.vmem [resolvable:$true] %s189_s30 }
 0x118   :  { %p1796_p7 = scmp.lt.u32.totalorder %s1792_s25, %s2559_s14 }
 0x11a   :  { %p1798_p8 = pnand %p1796_p7, %p1793_p6 }
 0x11c   :  { %1801 = shalt.err (!%p1798_p8)
}
 0x11d   :  { %s1802_s27 = scalar_lea.vmem %s190_s30, 512  ;;  %p1807_p10 = scmp.lt.s32.totalorder %s190_s30, %s190_s30 }
 0x11e   :  { %p1803_p9 = scmp.ne.s32.totalorder %s190_s30, %s1802_s27  ;;  %p1808_p11 = scmp.lt.s32.totalorder %s1802_s27, %s1802_s27 }
 0x120   :  { %p1809_p12 = por %p1808_p11, %p1807_p10 }
 0x122   :  { %p1810_p13 = pnand %p1809_p12, %p1803_p9 }
 0x124   :  { %1813 = shalt.err (!%p1810_p13)
}
 0x125   :  { %195 = dma.hbm_to_vmem [thread:$0]  %s2559_s14, 512, %s190_s30, [#allocation24], %s1925_s28, %s1925_s28, %s1926_s29  }
 0x126   :  { %1902 = dma.done.wait [#allocation3], 128  }
 0x127   :  { %1903 = vsyncadd [#allocation3], 4294967168 }
 0x128   :  { %1904 = dma.done.wait [#allocation6], 272  }
 0x129   :  { %1905 = vsyncadd [#allocation6], 4294967024 }
 0x12a   :  { %1906 = dma.done.wait [#allocation9], 528  }
 0x12b   :  { %1907 = vsyncadd [#allocation9], 4294966768 }
 0x12c   :  { %1908 = dma.done.wait [#allocation12], 272  }
 0x12d   :  { %1909 = vsyncadd [#allocation12], 4294967024 }
 0x12e   :  { %1910 = dma.done.wait [#allocation15], 1040  }
 0x12f   :  { %1911 = vsyncadd [#allocation15], 4294966256 }
 0x130   :  { %1912 = dma.done.wait [#allocation18], 272  }
 0x131   :  { %1913 = vsyncadd [#allocation18], 4294967024 }
 0x132   :  { %1914 = dma.done.wait [#allocation21], 528  }
 0x133   :  { %1915 = vsyncadd [#allocation21], 4294966768 }
 0x134   :  { %1916 = dma.done.wait [#allocation24], 512  }
 0x135   :  { %1917 = vsyncadd [#allocation24], 4294966784  ;;  %v1940_v0 = vmov 0.0   ;;  %vm1941_vm0 = vmmov 0   ;;  %v1462_v1 = vld [vmem:[#allocation5] sm:$0xff]   ;;  %v1463_v2 = vld [vmem:[#allocation5 + $0x8] sm:$0xff]  }
 0x136   :  { %1288 = vmatprep.subr.bf16.mxu0 %v1940_v0  ;;  %1292 = vmatprep.mubr.msk.bf16.mxu0 %vm1941_vm0, %v1940_v0  ;;  %s2596_s29 = sld [smem:[#allocation42_spill]]  ;;  %v248_v4 = vld [vmem:[#allocation2] sm:$0xff]  ;;  %vm273_vm1 = vcmask 261120   ;;  %v1466_v8 = vld [vmem:[#allocation8 + $0x10] sm:$0xff]   ;;  %v1467_v9 = vld [vmem:[#allocation8 + $0x18] sm:$0xff]   ;;  %vm360_vm2 = vcmask 523264  }
 0x137   :  { %1344 = vmatprep.subr.bf16.mxu1 %v1940_v0  ;;  %1352 = vmatprep.mubr.msk.bf16.mxu1 %vm1941_vm0, %v1940_v0  ;;  %v1464_v5 = vld [vmem:[#allocation8] sm:$0xff]   ;;  %v1465_v7 = vld [vmem:[#allocation8 + $0x8] sm:$0xff]   ;;  %v1187_v10 = vld [vmem:[#allocation7] ss:$0 sm:$0xff]  ;;  %s1944_s1 = smov [#allocation25]  }
 0x138   :  { %1289 = vmatpush3.bf16.msra.mxu0 %v1462_v1  ;;  %v1468_v20 = vld [vmem:[#allocation11] sm:$0xff]   ;;  %v1469_v21 = vld [vmem:[#allocation11 + $0x8] sm:$0xff]   ;;  %v2292_v24 = vld [vmem:[%s2563_s18 + $0x10] sm:$0xff]  ;;  %s1126_s23 = sshll.u32 %s1944_s1, 4  ;;  %s1127_s23 = int_to_ptr.vmem [resolvable:$true] %s1126_s23 }
 0x139   :  { %1290 = vmatprep.subr.bf16.mxu0 %v1940_v0  ;;  %v2282_v22 = vld [vmem:[%s2563_s18] sm:$0xff]  ;;  %v2287_v23 = vld [vmem:[%s2563_s18 + $0x8] sm:$0xff]  ;;  %v2301_v27 = vld [vmem:[%s2563_s18 + $0x18] sm:$0xff]  ;;  %v953_v28 = vmul.f32 %v2292_v24, %v2292_v24 }
 0x13a   :  { %v951_v25 = vmul.f32 %v2282_v22, %v2282_v22  ;;  %v1416_v26 = vpack.c.bf16 %v2287_v23, %v2282_v22  ;;  %v1419_v29 = vpack.c.bf16 %v2301_v27, %v2292_v24  ;;  %v2310_v30 = vld [vmem:[%s2563_s18 + $0x20] sm:$0xff]  ;;  %v2315_v31 = vld [vmem:[%s2563_s18 + $0x28] sm:$0xff]  ;;  %v2320_v32 = vld [vmem:[%s2563_s18 + $0x30] sm:$0xff]  ;;  %v952_v33 = vmul.f32 %v2287_v23, %v2287_v23 }
 0x13b   :  { %971 = vadd.xlane.f32.xlu1 %v953_v28  ;;  %v954_v34 = vmul.f32 %v2301_v27, %v2301_v27  ;;  %v1422_v35 = vpack.c.bf16 %v2315_v31, %v2310_v30  ;;  %v2331_v36 = vld [vmem:[%s2563_s18 + $0x38] sm:$0xff]  ;;  %v2336_v37 = vld [vmem:[%s2563_s18 + $0x40] sm:$0xff]  ;;  %v2341_v38 = vld [vmem:[%s2563_s18 + $0x48] sm:$0xff]  ;;  %v955_v49 = vmul.f32 %v2310_v30, %v2310_v30  ;;  %v956_v50 = vmul.f32 %v2315_v31, %v2315_v31 }
 0x13c   :  { %v247_v3 = vld [vmem:[%s2596_s29] sm:$0xff]  ;;  %1291 = vmatpush3.bf16.msra.mxu0 %v1463_v2  ;;  %967 = vadd.xlane.f32.xlu0 %v951_v25  ;;  %v1425_v39 = vpack.c.bf16 %v2331_v36, %v2320_v32  ;;  %v1428_v40 = vpack.c.bf16 %v2341_v38, %v2336_v37  ;;  %v2350_v41 = vld [vmem:[%s2563_s18 + $0x50] sm:$0xff]  ;;  %v2355_v42 = vld [vmem:[%s2563_s18 + $0x58] sm:$0xff]  ;;  %v957_v52 = vmul.f32 %v2320_v32, %v2320_v32 }
 0x13d   :  { %v253_v6 = vpack.c.bf16 %v248_v4, %v247_v3  ;;  %1296 = vmatprep.subr.bf16.mxu0 %v1940_v0  ;;  %v1431_v43 = vpack.c.bf16 %v2355_v42, %v2350_v41  ;;  %v2362_v44 = vld [vmem:[%s2563_s18 + $0x60] sm:$0xff]  ;;  %v2367_v45 = vld [vmem:[%s2563_s18 + $0x68] sm:$0xff]  ;;  %v2374_v47 = vld [vmem:[%s2563_s18 + $0x70] sm:$0xff]  ;;  %v958_v53 = vmul.f32 %v2331_v36, %v2331_v36  ;;  %v959_v54 = vmul.f32 %v2336_v37, %v2336_v37 }
 0x13e   :  { %v1434_v46 = vpack.c.bf16 %v2367_v45, %v2362_v44  ;;  %v2379_v48 = vld [vmem:[%s2563_s18 + $0x78] sm:$0xff]  ;;  %v960_v55 = vmul.f32 %v2341_v38, %v2341_v38  ;;  %v961_v56 = vmul.f32 %v2350_v41, %v2350_v41  ;;  %v962_v57 = vmul.f32 %v2355_v42, %v2355_v42  ;;  %v1226_v22 = vld [vmem:[%s2562_s17] ss:$0 sm:$0xff] }
 0x13f   :  { %1293 = vmatmul.mubr.msk.bf16.vlgmr.msra.gmra.mrb[0].mxu0 %vm273_vm1, %v253_v6  ;;  %973 = vadd.xlane.f32.xlu1 %v954_v34  ;;  %v1437_v51 = vpack.c.bf16 %v2379_v48, %v2374_v47  ;;  %v963_v58 = vmul.f32 %v2362_v44, %v2362_v44  ;;  %v964_v59 = vmul.f32 %v2367_v45, %v2367_v45  ;;  %v1191_v62 = vld [vmem:[#allocation10] ss:$0 sm:$0xff] }
 0x140   :  { %1297 = vmatpush3.bf16.msra.mxu0 %v1464_v5  ;;  %1304 = vmatprep.mubr.msk.bf16.mxu0 %vm1941_vm0, %v1940_v0  ;;  %v965_v60 = vmul.f32 %v2374_v47, %v2374_v47  ;;  %v966_v61 = vmul.f32 %v2379_v48, %v2379_v48 }
 0x141   :  { %1298 = vmatprep.subr.bf16.mxu0 %v1940_v0  ;;  %969 = vadd.xlane.f32.xlu0 %v952_v33 }
 0x143   :  { %977 = vadd.xlane.f32.xlu1 %v956_v50 }
 0x144   :  { %1299 = vmatpush3.bf16.msra.mxu0 %v1465_v7 }
 0x145   :  { %1300 = vmatprep.subr.bf16.mxu0 %v1940_v0  ;;  %975 = vadd.xlane.f32.xlu0 %v955_v49 }
 0x147   :  { %981 = vadd.xlane.f32.xlu1 %v958_v53 }
 0x148   :  { %1301 = vmatpush3.bf16.msra.mxu0 %v1466_v8  ;;  %v1470_v8 = vld [vmem:[#allocation14] sm:$0xff]  }
 0x149   :  { %1302 = vmatprep.subr.bf16.mxu0 %v1940_v0  ;;  %979 = vadd.xlane.f32.xlu0 %v957_v52 }
 0x14b   :  { %985 = vadd.xlane.f32.xlu1 %v960_v55 }
 0x14c   :  { %1303 = vmatpush3.bf16.msra.mxu0 %v1467_v9 }
 0x14d   :  { %1308 = vmatprep.subr.bf16.mxu0 %v1940_v0  ;;  %983 = vadd.xlane.f32.xlu0 %v959_v54 }
 0x14f   :  { %989 = vadd.xlane.f32.xlu1 %v962_v57  ;;  %v1197_v57 = vld [vmem:[#allocation13] ss:$0 sm:$0xff] }
 0x151   :  { %987 = vadd.xlane.f32.xlu0 %v961_v56 }
 0x153   :  { %993 = vadd.xlane.f32.xlu1 %v964_v59 }
 0x155   :  { %991 = vadd.xlane.f32.xlu0 %v963_v58 }
 0x157   :  { %997 = vadd.xlane.f32.xlu1 %v966_v61 }
 0x159   :  { %995 = vadd.xlane.f32.xlu0 %v965_v60 }
 0x212   :  { %v311_v11 = vpop.f32.mrb[0].mxu0 }
 0x213   :  { %v312_v12 = vadd.f32 %v1187_v10, %v311_v11  ;;  %v1294_v13 = vpop.f32.mrb[1].mxu0  ;;  %v1472_v11 = vld [vmem:[#allocation14 + $0x10] sm:$0xff]  }
 0x214   :  { %v314_v14 = vpop.f32.mrb[2].mxu0  ;;  %v1474_v13 = vld [vmem:[#allocation14 + $0x20] sm:$0xff]  }
 0x215   :  { %v315_v15 = vadd.f32 %v1187_v10, %v314_v14  ;;  %v1295_v16 = vpop.f32.mrb[3].mxu0  ;;  %v318_v17 = vmax.f32 %v312_v12, 0.0  ;;  %v1471_v10 = vld [vmem:[#allocation14 + $0x8] sm:$0xff]   ;;  %v1473_v12 = vld [vmem:[#allocation14 + $0x18] sm:$0xff]  }
 0x216   :  { %v1475_v14 = vld [vmem:[#allocation14 + $0x28] sm:$0xff]   ;;  %v1477_v16 = vld [vmem:[#allocation14 + $0x38] sm:$0xff]  }
 0x217   :  { %v319_v18 = vmax.f32 %v315_v15, 0.0  ;;  %v1476_v15 = vld [vmem:[#allocation14 + $0x30] sm:$0xff]  }
 0x219   :  { %v328_v19 = vpack.c.bf16 %v319_v18, %v318_v17  ;;  %v968_v17 = vpop.xlane.xlu0 %967 }
 0x21a   :  { %1069 = vxpose.xlu1.b32.start [1/16] (narrow) %v968_v17, 8  ;;  %v1483_v17 = vld [vmem:[%s2561_s16 + $0x8] sm:$0xff]  }
 0x21b   :  { %1305 = vmatmul.mubr.msk.bf16.vlgmr.msra.gmra.mrb[4].mxu0 %vm360_vm2, %v328_v19  ;;  %v972_v19 = vpop.xlane.xlu1 %971 }
 0x21c   :  { %1312 = vmatprep.mubr.msk.bf16.mxu0 %vm1941_vm0, %v1940_v0  ;;  %1309 = vmatpush3.bf16.msra.mxu0 %v1468_v20 }
 0x21d   :  { %1310 = vmatprep.subr.bf16.mxu0 %v1940_v0  ;;  %v970_v18 = vpop.xlane.xlu0 %969 }
 0x21e   :  { %1070 = vxpose.xlu1.b32.cont [2/16] (narrow) %v970_v18, 8  ;;  %v1485_v18 = vld [vmem:[%s2561_s16 + $0x10] sm:$0xff]  }
 0x21f   :  { %v974_v20 = vpop.xlane.xlu1 %973 }
 0x220   :  { %1311 = vmatpush3.bf16.msra.mxu0 %v1469_v21 }
 0x221   :  { %1316 = vmatprep.subr.bf16.mxu0 %v1940_v0  ;;  %v976_v21 = vpop.xlane.xlu0 %975 }
 0x222   :  { %1071 = vxpose.xlu1.b32.cont [3/16] (narrow) %v972_v19, 8  ;;  %v1486_v19 = vld [vmem:[#allocation20 + $0x18] sm:$0xff]  }
 0x223   :  { %v978_v25 = vpop.xlane.xlu1 %977 }
 0x225   :  { %v980_v28 = vpop.xlane.xlu0 %979 }
 0x226   :  { %1072 = vxpose.xlu1.b32.cont [4/16] (narrow) %v974_v20, 8  ;;  %v1487_v20 = vld [vmem:[%s2561_s16 + $0x18] sm:$0xff]  }
 0x227   :  { %v982_v33 = vpop.xlane.xlu1 %981 }
 0x229   :  { %v984_v34 = vpop.xlane.xlu0 %983 }
 0x22a   :  { %1073 = vxpose.xlu1.b32.cont [5/16] (narrow) %v976_v21, 8  ;;  %v1210_v21 = vld [vmem:[#allocation19] ss:$0 sm:$0xff] }
 0x22b   :  { %v986_v49 = vpop.xlane.xlu1 %985 }
 0x22d   :  { %v988_v50 = vpop.xlane.xlu0 %987 }
 0x22e   :  { %1074 = vxpose.xlu1.b32.cont [6/16] (narrow) %v978_v25, 8 }
 0x22f   :  { %v990_v52 = vpop.xlane.xlu1 %989 }
 0x231   :  { %v992_v53 = vpop.xlane.xlu0 %991 }
 0x232   :  { %1075 = vxpose.xlu1.b32.cont [7/16] (narrow) %v980_v28, 8 }
 0x233   :  { %v994_v54 = vpop.xlane.xlu1 %993 }
 0x235   :  { %v996_v55 = vpop.xlane.xlu0 %995 }
 0x236   :  { %1076 = vxpose.xlu1.b32.cont [8/16] (narrow) %v982_v33, 8 }
 0x237   :  { %v998_v56 = vpop.xlane.xlu1 %997 }
 0x23a   :  { %1077 = vxpose.xlu1.b32.cont [9/16] (narrow) %v984_v34, 8 }
 0x23e   :  { %1078 = vxpose.xlu1.b32.cont [10/16] (narrow) %v986_v49, 8 }
 0x242   :  { %1079 = vxpose.xlu1.b32.cont [11/16] (narrow) %v988_v50, 8 }
 0x246   :  { %1080 = vxpose.xlu1.b32.cont [12/16] (narrow) %v990_v52, 8  ;;  %v1488_v52 = vld [vmem:[#allocation23] sm:$0xff]  }
 0x24a   :  { %1081 = vxpose.xlu1.b32.cont [13/16] (narrow) %v992_v53, 8 }
 0x24e   :  { %1082 = vxpose.xlu1.b32.cont [14/16] (narrow) %v994_v54, 8  ;;  %v1489_v54 = vld [vmem:[#allocation23 + $0x8] sm:$0xff]  }
 0x252   :  { %1083 = vxpose.xlu1.b32.cont [15/16] (narrow) %v996_v55, 8  ;;  %v1490_v55 = vld [vmem:[#allocation23 + $0x10] sm:$0xff]  }
 0x256   :  { %1084 = vxpose.xlu1.b32.end [16/16] (narrow) %v998_v56, 8  ;;  %v1491_v56 = vld [vmem:[#allocation23 + $0x18] sm:$0xff]  }
 0x2ee   :  { %v398_v63 = vpop.f32.mrb[4].mxu0 }
 0x2ef   :  { %v399_v1 = vadd.f32 %v1191_v62, %v398_v63  ;;  %v1306_v2 = vpop.f32.mrb[5].mxu0 }
 0x2f0   :  { %v401_v3 = vpop.f32.mrb[6].mxu0 }
 0x2f1   :  { %v402_v4 = vadd.f32 %v1191_v62, %v401_v3  ;;  %v1307_v5 = vpop.f32.mrb[7].mxu0  ;;  %v405_v6 = vmax.f32 %v399_v1, 0.0  ;;  %v1478_v3 = vld [vmem:[#allocation17] sm:$0xff]  }
 0x2f2   :  { %v1480_v5 = vld [vmem:[#allocation20] sm:$0xff]  }
 0x2f3   :  { %v406_v7 = vmax.f32 %v402_v4, 0.0  ;;  %v1479_v4 = vld [vmem:[#allocation17 + $0x8] sm:$0xff]   ;;  %1345 = vmatpush3.bf16.msra.mxu1 %v1480_v5 }
 0x2f4   :  { %1346 = vmatprep.subr.bf16.mxu1 %v1940_v0 }
 0x2f5   :  { %v411_v9 = vpack.c.bf16 %v406_v7, %v405_v6  ;;  %v1482_v6 = vld [vmem:[#allocation20 + $0x8] sm:$0xff]   ;;  %v1484_v7 = vld [vmem:[#allocation20 + $0x10] sm:$0xff]  }
 0x2f7   :  { %1313 = vmatmul.mubr.msk.bf16.vlgmr.msra.gmra.mrb[8].mxu0 %vm273_vm1, %v411_v9  ;;  %1347 = vmatpush3.bf16.msra.mxu1 %v1482_v6 }
 0x2f8   :  { %1317 = vmatpush3.bf16.msra.mxu0 %v1470_v8  ;;  %1332 = vmatprep.mubr.msk.bf16.mxu0 %vm1941_vm0, %v1940_v0  ;;  %v1201_v8 = vld [vmem:[#allocation16] ss:$0 sm:$0xff] }
 0x2f9   :  { %1318 = vmatprep.subr.bf16.mxu0 %v1940_v0  ;;  %1348 = vmatprep.subr.bf16.mxu1 %v1940_v0 }
 0x2fb   :  { %1349 = vmatpush3.bf16.msra.mxu1 %v1484_v7 }
 0x2fc   :  { %1319 = vmatpush3.bf16.msra.mxu0 %v1471_v10  ;;  %1350 = vmatprep.subr.bf16.mxu1 %v1940_v0 }
 0x2fd   :  { %1320 = vmatprep.subr.bf16.mxu0 %v1940_v0 }
 0x2ff   :  { %1351 = vmatpush3.bf16.msra.mxu1 %v1486_v19 }
 0x300   :  { %1321 = vmatpush3.bf16.msra.mxu0 %v1472_v11  ;;  %1356 = vmatprep.subr.bf16.mxu1 %v1940_v0 }
 0x301   :  { %1322 = vmatprep.subr.bf16.mxu0 %v1940_v0 }
 0x304   :  { %1323 = vmatpush3.bf16.msra.mxu0 %v1473_v12 }
 0x305   :  { %1324 = vmatprep.subr.bf16.mxu0 %v1940_v0 }
 0x308   :  { %1325 = vmatpush3.bf16.msra.mxu0 %v1474_v13 }
 0x309   :  { %1326 = vmatprep.subr.bf16.mxu0 %v1940_v0 }
 0x30c   :  { %1327 = vmatpush3.bf16.msra.mxu0 %v1475_v14 }
 0x30d   :  { %1328 = vmatprep.subr.bf16.mxu0 %v1940_v0 }
 0x310   :  { %1329 = vmatpush3.bf16.msra.mxu0 %v1476_v15  ;;  %v1481_v15 = vld [vmem:[%s2561_s16] sm:$0xff]  }
 0x311   :  { %1330 = vmatprep.subr.bf16.mxu0 %v1940_v0 }
 0x314   :  { %1331 = vmatpush3.bf16.msra.mxu0 %v1477_v16 }
 0x315   :  { %1336 = vmatprep.subr.bf16.mxu0 %v1940_v0 }
 0x3ca   :  { %v468_v58 = vpop.f32.mrb[8].mxu0 }
 0x3cb   :  { %v469_v59 = vadd.f32 %v1197_v57, %v468_v58  ;;  %v1314_v60 = vpop.f32.mrb[9].mxu0 }
 0x3cc   :  { %v471_v61 = vpop.f32.mrb[10].mxu0 }
 0x3cd   :  { %v492_v62 = vpack.c.bf16 %v469_v59, %v469_v59  ;;  %v2418_v63 = vadd.f32 %v1197_v57, %v471_v61  ;;  %v1315_v1 = vpop.f32.mrb[11].mxu0  ;;  %v1942_v57 = vmov 0.0|0.0  }
 0x3cf   :  { %475 = vst [vmem:[#allocation25] sm:$0xff] %v2418_v63  ;;  %1333 = vmatmul.mubr.bf16.vlgmr.msra.gmra.mrb[12].mxu0 %v492_v62  ;;  %v948_v2 = vmul.f32 %v2418_v63, %v2418_v63 }
 0x3d0   :  { %1340 = vmatprep.mubr.msk.bf16.mxu0 %vm1941_vm0, %v1940_v0  ;;  %1337 = vmatpush3.bf16.msra.mxu0 %v1478_v3 }
 0x3d1   :  { %949 = vadd.xlane.f32.xlu0 %v948_v2  ;;  %1338 = vmatprep.subr.bf16.mxu0 %v1940_v0 }
 0x3d4   :  { %1339 = vmatpush3.bf16.msra.mxu0 %v1479_v4 }
 0x3d5   :  { %1368 = vmatprep.subr.bf16.mxu0 %v1940_v0 }
 0x45e   :  { %v950_v19 = vpop.xlane.xlu0 %949 }
 0x4a2   :  { %v582_v9 = vpop.f32.mrb[12].mxu0 }
 0x4a3   :  { %v583_v10 = vadd.f32 %v1201_v8, %v582_v9  ;;  %v1334_v11 = vpop.f32.mrb[13].mxu0 }
 0x4a4   :  { %v585_v12 = vpop.f32.mrb[14].mxu0 }
 0x4a5   :  { %v588_v13 = vmax.f32 %v583_v10, 0.0  ;;  %v1335_v14 = vpop.f32.mrb[15].mxu0 }
 0x4a6   :  { %v1101_v14 = vlaneseq }
 0x4a7   :  { %v593_v16 = vpack.c.bf16 %v588_v13, %v588_v13 }
 0x4a9   :  { %1341 = vmatmul.mubr.msk.bf16.vlgmr.msra.gmra.mrb[16].mxu0 %vm273_vm1, %v593_v16 }
 0x4aa   :  { %1369 = vmatpush3.bf16.msra.mxu0 %v1481_v15  ;;  %1376 = vmatprep.mubr.msk.bf16.mxu0 %vm1941_vm0, %v1940_v0  ;;  %v1102_v15 = vshrl.u32 %v1101_v14, 7 }
 0x4ab   :  { %1370 = vmatprep.subr.bf16.mxu0 %v1940_v0 }
 0x4ac   :  { %v1103_v16 = vsub.s32 0, %v1102_v15 }
 0x4ae   :  { %1371 = vmatpush3.bf16.msra.mxu0 %v1483_v17  ;;  %v1085_v17 = vpop.trf.xlu1 }
 0x4af   :  { %1372 = vmatprep.subr.bf16.mxu0 %v1940_v0 }
 0x4b2   :  { %1373 = vmatpush3.bf16.msra.mxu0 %v1485_v18  ;;  %v1104_v18 = vrot.slane %v1085_v17, %v1103_v16 }
 0x4b3   :  { %1374 = vmatprep.subr.bf16.mxu0 %v1940_v0 }
 0x4b6   :  { %1375 = vmatpush3.bf16.msra.mxu0 %v1487_v20 }
 0x57c   :  { %v650_v25 = vpop.f32.mrb[16].mxu0 }
 0x57d   :  { %v651_v28 = vadd.f32 %v1210_v21, %v650_v25  ;;  %v1342_v33 = vpop.f32.mrb[17].mxu0  ;;  %v1105_v21 = vadd.f32 %v1104_v18, %v950_v19 }
 0x57e   :  { %v653_v34 = vpop.f32.mrb[18].mxu0 }
 0x57f   :  { %v656_v49 = vmax.f32 %v651_v28, 0.0  ;;  %v1343_v50 = vpop.f32.mrb[19].mxu0 }
 0x580   :  { %v1112_v50 = vand.u32 127, %v1101_v14 }
 0x581   :  { %v665_v53 = vpack.c.bf16 %v656_v49, %v656_v49 }
 0x582   :  { %vm1113_vm5 = vcmp.lt.s32.totalorder %v1112_v50, 4 }
 0x583   :  { %1353 = vmatmul.mubr.msk.bf16.vlgmr.msra.gmra.mrb[0].mxu1 %vm360_vm2, %v665_v53  ;;  %1377 = vmatmul.mubr.msk.bf16.vlgmr.msra.gmra.mrb[20].mxu0 %vm360_vm2, %v665_v53 }
 0x584   :  { %1357 = vmatpush3.bf16.msra.mxu1 %v1488_v52  ;;  %1364 = vmatprep.mubr.msk.bf16.mxu1 %vm1941_vm0, %v1940_v0 }
 0x585   :  { %1358 = vmatprep.subr.bf16.mxu1 %v1940_v0 }
 0x588   :  { %1359 = vmatpush3.bf16.msra.mxu1 %v1489_v54 }
 0x589   :  { %1360 = vmatprep.subr.bf16.mxu1 %v1940_v0 }
 0x58c   :  { %1361 = vmatpush3.bf16.msra.mxu1 %v1490_v55 }
 0x58d   :  { %1362 = vmatprep.subr.bf16.mxu1 %v1940_v0 }
 0x590   :  { %1363 = vmatpush3.bf16.msra.mxu1 %v1491_v56 }
 0x591   :  { %1415 = vmatprep.subr.bf16.mxu1 %v1942_v57 }
 0x593   :  { %1365 = vmatmul.mubr.msk.bf16.vlgmr.msra.gmra.mrb[4].mxu1 %vm360_vm2, %v665_v53 }
 0x594   :  { %1412 = vmatprep.mubr.msk.f32.mxu1 %vm1941_vm0, %v1940_v0  ;;  %v1214_v0 = vld [vmem:[#allocation22] ss:$0 sm:$0xff] }
 0x599   :  { %1417 = vmatpush3.bf16.xpose.msra.mxu1 %v1416_v26 }
 0x59a   :  { %1418 = vmatprep.subr.bf16.mxu1 %v1942_v57 }
 0x5a1   :  { %1420 = vmatpush3.bf16.xpose.msra.mxu1 %v1419_v29 }
 0x5a2   :  { %1421 = vmatprep.subr.bf16.mxu1 %v1942_v57 }
 0x5a9   :  { %1423 = vmatpush3.bf16.xpose.msra.mxu1 %v1422_v35 }
 0x5aa   :  { %1424 = vmatprep.subr.bf16.mxu1 %v1942_v57 }
 0x5b1   :  { %1426 = vmatpush3.bf16.xpose.msra.mxu1 %v1425_v39 }
 0x5b2   :  { %1427 = vmatprep.subr.bf16.mxu1 %v1942_v57 }
 0x5b9   :  { %1429 = vmatpush3.bf16.xpose.msra.mxu1 %v1428_v40  ;;  %v1220_v40 = vld [vmem:[%s2560_s15] ss:$0 sm:$0xff]  ;;  %s1943_s15 = smov [#allocation26]  }
 0x5ba   :  { %1430 = vmatprep.subr.bf16.mxu1 %v1942_v57  ;;  %s1138_s17 = sshll.u32 %s1943_s15, 4  ;;  %s1139_s17 = int_to_ptr.vmem [resolvable:$true] %s1138_s17 }
 0x5bb   :  { %s1814_s27 = scalar_lea.vmem %s1139_s17, 128  ;;  %p1819_p1 = scmp.lt.s32.totalorder %s1139_s17, %s1139_s17 }
 0x5bc   :  { %p1815_p0 = scmp.ne.s32.totalorder %s1139_s17, %s1814_s27  ;;  %p1820_p2 = scmp.lt.s32.totalorder %s1814_s27, %s1814_s27 }
 0x5be   :  { %p1821_p3 = por %p1820_p2, %p1819_p1 }
 0x5c0   :  { %p1822_p4 = pnand %p1821_p3, %p1815_p0 }
 0x5c1   :  { %1432 = vmatpush3.bf16.xpose.msra.mxu1 %v1431_v43 }
 0x5c2   :  { %1433 = vmatprep.subr.bf16.mxu1 %v1942_v57 }
 0x5c9   :  { %1435 = vmatpush3.bf16.xpose.msra.mxu1 %v1434_v46 }
 0x5ca   :  { %1436 = vmatprep.subr.bf16.mxu1 %v1942_v57 }
 0x5d1   :  { %1438 = vmatpush3.bf16.xpose.msra.mxu1 %v1437_v51 }
 0x5d8   :  { %1413 = vmatmul.mubr.f32.vlgmr.msra.gmra.mrb[8].mxu1 %v2418_v63 }
 0x656   :  { %v734_v23 = vpop.f32.mrb[0].mxu1  ;;  %v919_v24 = vpop.f32.mrb[20].mxu0 }
 0x657   :  { %v735_v26 = vadd.f32 %v1214_v0, %v734_v23  ;;  %v920_v27 = vadd.f32 %v1226_v22, %v919_v24  ;;  %v1354_v29 = vpop.f32.mrb[1].mxu1  ;;  %v1378_v30 = vpop.f32.mrb[21].mxu0 }
 0x658   :  { %v737_v31 = vpop.f32.mrb[2].mxu1  ;;  %v922_v32 = vpop.f32.mrb[22].mxu0 }
 0x659   :  { %v740_v35 = vmin.f32 %v735_v26, 13.815511  ;;  %v1232_v36 = vmul.f32 -1.442695, %v920_v27  ;;  %v1355_v37 = vpop.f32.mrb[3].mxu1  ;;  %v1379_v38 = vpop.f32.mrb[23].mxu0 }
 0x65b   :  { %v741_v39 = vmul.f32 1.442695, %v740_v35  ;;  %1492 = vpow2.f32 %v1232_v36 }
 0x65d   :  { %1494 = vpow2.f32 %v741_v39 }
 0x665   :  { %v1493_v41 = vpop.eup %1492 }
 0x666   :  { %v928_v42 = vadd.f32 1.0, %v1493_v41  ;;  %v819_v43 = vpop.f32.mrb[4].mxu1 }
 0x667   :  { %v1495_v44 = vpop.eup %1494  ;;  %v820_v45 = vadd.f32 %v1220_v40, %v819_v43  ;;  %v1366_v46 = vpop.f32.mrb[5].mxu1 }
 0x668   :  { %1496 = vrcp.f32 %v928_v42  ;;  %v822_v47 = vpop.f32.mrb[6].mxu1  ;;  %v743_v48 = vmax.f32 %v1495_v44, 1e-05 }
 0x669   :  { %v828_v51 = vand.u32 2147483647, %v820_v45  ;;  %v1367_v58 = vpop.f32.mrb[7].mxu1  ;;  %v825_v8 = vmax.f32 %v820_v45, 0.0  ;;  %vm826_vm4 = vcmp.ne.f32.partialorder %v820_v45, %v820_v45 }
 0x66a   :  { %v744_v59 = vmin.f32 %v743_v48, 1000000.0 }
 0x66b   :  { %v829_v60 = vsub.f32 0.0, %v828_v51 }
 0x66c   :  { %745 = vst [vmem:[#allocation26] sm:$0xff] %v744_v59 }
 0x66d   :  { %v830_v61 = vmul.f32 1.442695, %v829_v60 }
 0x66f   :  { %1498 = vpow2.f32 %v830_v61 }
 0x672   :  { %v1497_v62 = vpop.eup %1496 }
 0x673   :  { %931 = vst [vmem:[#allocation29] sm:$0xff] %v1497_v62 }
 0x679   :  { %v1499_v63 = vpop.eup %1498 }
 0x67a   :  { %v832_v1 = vadd.f32 1.0, %v1499_v63  ;;  %v835_v2 = vmul.f32 -0.5, %v1499_v63  ;;  %v838_v4 = vand.u32 2147483647, %v1499_v63 }
 0x67c   :  { %1500 = vlog2.f32 %v832_v1  ;;  %v836_v3 = vadd.f32 1.0, %v835_v2  ;;  %vm839_vm3 = vcmp.lt.f32.partialorder %v838_v4, 0.0004427343 }
 0x67e   :  { %v837_v7 = vmul.f32 %v1499_v63, %v836_v3 }
 0x686   :  { %v1501_v5 = vpop.eup %1500 }
 0x687   :  { %v834_v6 = vmul.f32 0.6931472, %v1501_v5 }
 0x689   :  { %v840_v9 = vsel %vm839_vm3, %v837_v7, %v834_v6 }
 0x68a   :  { %v841_v10 = vadd.f32 %v840_v9, %v825_v8 }
 0x68c   :  { %v842_v11 = vsel %vm826_vm4, %v820_v45, %v841_v10 }
 0x68d   :  { %v843_v12 = vmax.f32 %v842_v11, 0.0001 }
 0x68f   :  { %v844_v13 = vmin.f32 %v843_v12, 10000.0 }
 0x691   :  { %845 = vst [vmem:[#allocation28] sm:$0xff] %v844_v13 }
 0x6ab   :  { %v1065_v20 = vpop.f32.mrb[8].mxu1 }
 0x6ac   :  { %v1106_v25 = vmul.f32 2.0, %v1065_v20  ;;  %v1414_v28 = vpop.f32.mrb[9].mxu1 }
 0x6ae   :  { %v1107_v33 = vsub.f32 %v1105_v21, %v1106_v25 }
 0x6b0   :  { %v1108_v34 = vmax.f32 %v1107_v33, 0.0 }
 0x6b2   :  { %v1109_v49 = vadd.f32 1.0, %v1108_v34 }
 0x6b4   :  { %1502 = vrcp.f32 %v1109_v49 }
 0x6be   :  { %v1503_v52 = vpop.eup %1502 }
 0x6bf   :  { %v2490_v53 = vsel %vm1113_vm5, %v1503_v52, 0.0 }
 0x6c0   :  { %1115 = vadd.xlane.f32.xlu0 %v2490_v53 }
 0x6c1   :  { %1825 = shalt.err (!%p1822_p4)
}
 0x6c2   :  { %s1826_s14 = scalar_lea.hbm %s2566_s21, 128 }
 0x6c3   :  { %p1827_p5 = scmp.ne.s32.totalorder %s2566_s21, %s1826_s14  ;;  %p1830_p6 = scmp.lt.u32.totalorder %s1826_s14, %s2566_s21 }
 0x6c5   :  { %p1832_p7 = pnand %p1830_p6, %p1827_p5 }
 0x6c7   :  { %1835 = shalt.err (!%p1832_p7)
}
 0x6c8   :  { %1141 = dma.vmem_to_hbm [thread:$0]  %s1139_s17, 128, %s2566_s21, [#allocation27]  }
 0x6c9   :  { %s1836_s5 = scalar_lea.vmem %s1127_s23, 128  ;;  %p1841_p9 = scmp.lt.s32.totalorder %s1127_s23, %s1127_s23 }
 0x6ca   :  { %p1837_p8 = scmp.ne.s32.totalorder %s1127_s23, %s1836_s5  ;;  %p1842_p10 = scmp.lt.s32.totalorder %s1836_s5, %s1836_s5 }
 0x6cc   :  { %p1843_p11 = por %p1842_p10, %p1841_p9 }
 0x6ce   :  { %p1844_p12 = pnand %p1843_p11, %p1837_p8 }
 0x6d0   :  { %1847 = shalt.err (!%p1844_p12)
}
 0x6d1   :  { %s1848_s18 = scalar_lea.hbm %s2564_s19, 128 }
 0x6d2   :  { %p1849_p13 = scmp.ne.s32.totalorder %s2564_s19, %s1848_s18  ;;  %p1852_p0 = scmp.lt.u32.totalorder %s1848_s18, %s2564_s19 }
 0x6d4   :  { %p1854_p1 = pnand %p1852_p0, %p1849_p13 }
 0x6d6   :  { %1857 = shalt.err (!%p1854_p1)
}
 0x6d7   :  { %1129 = dma.vmem_to_hbm [thread:$0]  %s1127_s23, 128, %s2564_s19, [#allocation4]  }
 0x6d8   :  { %s1945_s7 = smov [#allocation28]   ;;  %s1946_s16 = smov [#allocation29]  }
 0x6d9   :  { %s1148_s22 = sshll.u32 %s1945_s7, 4  ;;  %s1158_s25 = sshll.u32 %s1946_s16, 4  ;;  %s1149_s22 = int_to_ptr.vmem [resolvable:$true] %s1148_s22  ;;  %s1159_s25 = int_to_ptr.vmem [resolvable:$true] %s1158_s25 }
 0x6da   :  { %s1858_s9 = scalar_lea.vmem %s1149_s22, 128  ;;  %p1863_p3 = scmp.lt.s32.totalorder %s1149_s22, %s1149_s22 }
 0x6db   :  { %p1859_p2 = scmp.ne.s32.totalorder %s1149_s22, %s1858_s9  ;;  %p1864_p4 = scmp.lt.s32.totalorder %s1858_s9, %s1858_s9 }
 0x6dd   :  { %p1865_p5 = por %p1864_p4, %p1863_p3 }
 0x6df   :  { %p1866_p6 = pnand %p1865_p5, %p1859_p2 }
 0x6e1   :  { %1869 = shalt.err (!%p1866_p6)
}
 0x6e2   :  { %s2597_s17 = sld [smem:[#allocation51_spill]] }
 0x6e8   :  { %s1870_s1 = scalar_lea.hbm %s2597_s17, 128 }
 0x6e9   :  { %p1871_p7 = scmp.ne.s32.totalorder %s2597_s17, %s1870_s1  ;;  %p1874_p8 = scmp.lt.u32.totalorder %s1870_s1, %s2597_s17 }
 0x6eb   :  { %p1876_p9 = pnand %p1874_p8, %p1871_p7 }
 0x6ed   :  { %1879 = shalt.err (!%p1876_p9)
}
 0x6ee   :  { %1151 = dma.vmem_to_hbm [thread:$0]  %s1149_s22, 128, %s2597_s17, [#allocation27]  }
 0x6ef   :  { %s1880_s28 = scalar_lea.vmem %s1159_s25, 128  ;;  %p1885_p11 = scmp.lt.s32.totalorder %s1159_s25, %s1159_s25 }
 0x6f0   :  { %p1881_p10 = scmp.ne.s32.totalorder %s1159_s25, %s1880_s28  ;;  %p1886_p12 = scmp.lt.s32.totalorder %s1880_s28, %s1880_s28 }
 0x6f2   :  { %p1887_p13 = por %p1886_p12, %p1885_p11 }
 0x6f4   :  { %p1888_p0 = pnand %p1887_p13, %p1881_p10 }
 0x6f6   :  { %1891 = shalt.err (!%p1888_p0)
}
 0x6f7   :  { %s2598_s6 = sld [smem:[#allocation52_spill]] }
 0x6fd   :  { %s1892_s2 = scalar_lea.hbm %s2598_s6, 128 }
 0x6fe   :  { %p1893_p1 = scmp.ne.s32.totalorder %s2598_s6, %s1892_s2  ;;  %p1896_p2 = scmp.lt.u32.totalorder %s1892_s2, %s2598_s6 }
 0x700   :  { %p1898_p3 = pnand %p1896_p2, %p1893_p1 }
 0x702   :  { %1901 = shalt.err (!%p1898_p3)
}
 0x703   :  { %1161 = dma.vmem_to_hbm [thread:$0]  %s1159_s25, 128, %s2598_s6, [#allocation30]  }
 0x704   :  { %s2599_s4 = sld [smem:[#allocation50_spill]] }
 0x74d   :  { %v1116_v54 = vpop.xlane.xlu0 %1115 }
 0x74e   :  { %1504 = vrcp.f32 %v1116_v54 }
 0x758   :  { %v1505_v55 = vpop.eup %1504 }
 0x759   :  { %v1118_v56 = vmul.f32 %v1505_v55, %v2490_v53 }
 0x75b   :  { %1119 = vst [vmem:[%s2599_s4] sm:$0xff] %v1118_v56 }
 0x75c   :  { %1918 = dma.done.wait [#allocation4], 128  }
 0x75d   :  { %1919 = vsyncadd [#allocation4], 4294967168 }
 0x75e   :  { %1920 = dma.done.wait [#allocation27], 256  }
 0x75f   :  { %1921 = vsyncadd [#allocation27], 4294967040 }
 0x760   :  { %1922 = dma.done.wait [#allocation30], 128  }
 0x761   :  { %1923 = vsyncadd [#allocation30], 4294967168 }
 0x762   :  { %1176 = vsyncpa [#allocation3], 1 }
 0x763   :  { %1177 = vsyncpa [#allocation6], 1 }
 0x764   :  { %1178 = vsyncpa [#allocation9], 1 }
 0x765   :  { %1179 = vsyncpa [#allocation12], 1 }
 0x766   :  { %1180 = vsyncpa [#allocation15], 1 }
 0x767   :  { %1181 = vsyncpa [#allocation18], 1 }
 0x768   :  { %1182 = vsyncpa [#allocation21], 1 }
 0x769   :  { %1183 = vsyncpa [#allocation24], 1 }
 0x76a   :  { %1184 = vsyncpa [#allocation4], 1 }
 0x76b   :  { %1185 = vsyncpa [#allocation27], 1 }
 0x76c   :  { %1186 = vsyncpa [#allocation30], 1 }

</bundles_post_ra>
